<compile_context>
chip_gen: v6e
topology: v6e:2x2x1
jax: 0.10.0
libtpu: 0.0.40
codegen_flags: <defaults>
</compile_context>

<pallas_src>
import math

import numpy as np
import jax
import jax.numpy as jnp
from jax import lax
from jax.experimental import pallas as pl
from jax.experimental.pallas import tpu as pltpu


# --------------------------------------------------------------------------
# Minimal host-side irreps machinery (numpy / python, no e3nn dependency).
# An irrep is a tuple (l, p) with p in {+1, -1}; Irreps is a list of (mul, ir).
# --------------------------------------------------------------------------
def irrep_dim(ir):
    l, _ = ir
    return 2 * l + 1


def irreps_dim(irreps):
    return sum(mul * irrep_dim(ir) for mul, ir in irreps)


def irreps_num(irreps):
    return sum(mul for mul, _ in irreps)


def irreps_slices(irreps):
    out, off = [], 0
    for mul, ir in irreps:
        d = mul * irrep_dim(ir)
        out.append((off, off + d))
        off += d
    return out


def irrep_product(ir1, ir2):
    (l1, p1), (l2, p2) = ir1, ir2
    return [(l, p1 * p2) for l in range(abs(l1 - l2), l1 + l2 + 1)]


def irrep_sort_key(ir):
    # e3nn iterator order: 0e, 0o, 1o, 1e, 2e, 2o, ...
    l, p = ir
    return (l, 0 if p == (-1) ** l else 1)


def wigner_3j(l1, l2, l3):
    """Real-basis Wigner-3j, hard-coded for l <= 1 (e3nn convention up to a
    global sign, which is itself only a basis convention)."""
    key = (l1, l2, l3)
    if key == (0, 0, 0):
        return np.ones((1, 1, 1), np.float64)
    if key == (0, 1, 1):
        return np.eye(3, dtype=np.float64)[None, :, :] / math.sqrt(3.0)
    if key == (1, 0, 1):
        return np.eye(3, dtype=np.float64)[:, None, :] / math.sqrt(3.0)
    if key == (1, 1, 0):
        return np.eye(3, dtype=np.float64)[:, :, None] / math.sqrt(3.0)
    if key == (1, 1, 1):
        eps = np.zeros((3, 3, 3), np.float64)
        for i, j, k in [(0, 1, 2), (1, 2, 0), (2, 0, 1)]:
            eps[i, j, k] = 1.0
            eps[j, i, k] = -1.0
        return eps / math.sqrt(6.0)
    # TODO(synk): general real Wigner-3j (l >= 2) not generated here; the demo
    # uses filter_ir_out to restrict outputs to l <= 1.
    raise NotImplementedError(f"wigner_3j{key} not hard-coded")


def align_two_irreps(irreps1, irreps2):
    assert irreps_num(irreps1) == irreps_num(irreps2)
    irreps1 = list(irreps1)
    irreps2 = list(irreps2)
    i = 0
    while i < min(len(irreps1), len(irreps2)):
        mul_1, ir_1 = irreps1[i]
        mul_2, ir_2 = irreps2[i]
        if mul_1 < mul_2:
            irreps2[i] = (mul_1, ir_2)
            irreps2.insert(i + 1, (mul_2 - mul_1, ir_2))
        if mul_2 < mul_1:
            irreps1[i] = (mul_2, ir_1)
            irreps1.insert(i + 1, (mul_1 - mul_2, ir_1))
        i += 1
    assert [m for m, _ in irreps1] == [m for m, _ in irreps2]
    return irreps1, irreps2


def build_elementwise_tp(irreps_in1, irreps_in2, filter_ir_out=None,
                         irrep_normalization="component"):
    """Mirrors ElementwiseTensorProduct.__init__: builds paths, CG buffers and
    the output-sorting permutation `inv`."""
    if irreps_num(irreps_in1) != irreps_num(irreps_in2):
        raise ValueError("inputs must have the same number of irreps")
    irreps_in1, irreps_in2 = align_two_irreps(irreps_in1, irreps_in2)

    paths = []
    irreps_out = []
    for (mul_1, ir_1), (s1, _), (_, ir_2), (s2, _) in zip(
            irreps_in1, irreps_slices(irreps_in1),
            irreps_in2, irreps_slices(irreps_in2)):
        for ir_out in irrep_product(ir_1, ir_2):
            if filter_ir_out is not None and ir_out not in filter_ir_out:
                continue
            cg = wigner_3j(ir_1[0], ir_2[0], ir_out[0])
            if irrep_normalization == "component":
                cg = cg * math.sqrt(irrep_dim(ir_out))
            elif irrep_normalization == "norm":
                cg = cg * math.sqrt(irrep_dim(ir_1) * irrep_dim(ir_2))
            else:
                raise ValueError(irrep_normalization)
            paths.append(dict(cg=cg,
                              s1=s1, d1=irrep_dim(ir_1),
                              s2=s2, d2=irrep_dim(ir_2),
                              mul=mul_1, d3=irrep_dim(ir_out)))
            irreps_out.append((mul_1, ir_out))

    # Stable sort of output irreps, same as e3nn Irreps.sort(); `inv[j]` is the
    # original chunk index of the j-th sorted chunk (forward cats chunks[inv]).
    inv = tuple(sorted(range(len(irreps_out)),
                       key=lambda i: (irrep_sort_key(irreps_out[i][1]), i)))
    irreps_out_sorted = [irreps_out[i] for i in inv]
    return paths, inv, irreps_in1, irreps_in2, irreps_out_sorted


def _round_up(x, m):
    return ((x + m - 1) // m) * m


def build_gather_scatter(paths, inv, d1_tot, d2_tot, lane=128):
    """Builds the compile-time constant matrices for
        out = ((x1 @ G1) * (x2 @ G2)) @ W
    G1:(D1, T_pad), G2:(D2, T_pad) are 0/1 gathers of the sparse CG terms;
    W:(T_pad, Dout_pad) scatters each term into its (sorted/concatenated)
    output column with the CG coefficient folded in.  T and Dout are padded to
    a lane multiple (128) so all kernel vregs / stores are lane-dense."""
    terms = []   # (coeff, in1_col, in2_col, out_col)
    col = 0
    for idx in inv:
        p = paths[idx]
        cg, s1, d1, s2, d2, mul, d3 = (p["cg"], p["s1"], p["d1"], p["s2"],
                                       p["d2"], p["mul"], p["d3"])
        for u in range(mul):
            for k in range(d3):
                for i in range(d1):
                    for j in range(d2):
                        c = float(cg[i, j, k])
                        if c != 0.0:
                            terms.append((c, s1 + u * d1 + i,
                                          s2 + u * d2 + j, col))
                col += 1
    dout = col
    n_terms = len(terms)
    t_pad = max(lane, _round_up(n_terms, lane))
    dout_pad = max(lane, _round_up(dout, lane))

    g1 = np.zeros((d1_tot, t_pad), np.float32)
    g2 = np.zeros((d2_tot, t_pad), np.float32)
    w = np.zeros((t_pad, dout_pad), np.float32)
    for t, (c, a, b, oc) in enumerate(terms):
        g1[a, t] = 1.0
        g2[b, t] = 1.0
        w[t, oc] = c          # CG coefficient folded into the scatter matmul
    return g1, g2, w, dout


# --------------------------------------------------------------------------
# Pallas kernel: lane-dense gather -> elementwise product -> scatter
#   out = ((x1 @ G1) * (x2 @ G2)) @ W          (all padded to 128 lanes)
# --------------------------------------------------------------------------
def _etp_kernel(x1_ref, x2_ref, g1_ref, g2_ref, w_ref, o_ref):
    x1 = x1_ref[...]                       # (TB, D1)
    x2 = x2_ref[...]                       # (TB, D2)
    t1 = jnp.dot(x1, g1_ref[...], preferred_element_type=jnp.float32,
                 precision=lax.Precision.HIGHEST)          # (TB, T_pad)
    t2 = jnp.dot(x2, g2_ref[...], preferred_element_type=jnp.float32,
                 precision=lax.Precision.HIGHEST)          # (TB, T_pad)
    prod = t1 * t2                                         # full-lane VPU mul
    o_ref[...] = jnp.dot(prod, w_ref[...], preferred_element_type=jnp.float32,
                         precision=lax.Precision.HIGHEST).astype(o_ref.dtype)


def _pick_batch_tile(B, block_batch):
    tb = min(block_batch, B)
    # Keep at least 2 grid steps (when B allows it) so the "parallel" batch axis
    # can shard across v7x's two TensorCores.
    if tb >= B and B >= 16:
        tb = (B + 1) // 2
    # Sublane multiple (8 for fp32).
    tb = max(8, _round_up(tb, 8))
    return tb


def elementwise_tensor_product(x1, x2, paths, inv, *, block_batch=1024):
    """Forward pass of ElementwiseTensorProduct via a Pallas TPU kernel.

    x1: (..., irreps_in1.dim), x2: (..., irreps_in2.dim) -> (..., irreps_out.dim)
    """
    lead = x1.shape[:-1]
    assert x2.shape[:-1] == lead, "leading shapes must match (no broadcasting in demo)"
    B = int(np.prod(lead)) if lead else 1
    d1_tot, d2_tot = x1.shape[-1], x2.shape[-1]

    g1_np, g2_np, w_np, dout = build_gather_scatter(paths, inv, d1_tot, d2_tot)
    t_pad = g1_np.shape[1]
    dout_pad = w_np.shape[1]

    # 0/1 gathers in the input dtype (exact); coefficient scatter stays fp32.
    g1 = jnp.asarray(g1_np, x1.dtype)
    g2 = jnp.asarray(g2_np, x2.dtype)
    w = jnp.asarray(w_np, jnp.float32)

    x1f = x1.reshape(B, d1_tot)
    x2f = x2.reshape(B, d2_tot)

    tb = _pick_batch_tile(B, block_batch)

    # Note: ragged last tile (B % tb != 0) reads padding rows and masks them on
    # the output store — harmless for this purely per-row elementwise op.
    out_pad = pl.pallas_call(
        _etp_kernel,
        out_shape=jax.ShapeDtypeStruct((B, dout_pad), x1.dtype),
        grid=(pl.cdiv(B, tb),),
        in_specs=[
            pl.BlockSpec((tb, d1_tot), lambda i: (i, 0)),
            pl.BlockSpec((tb, d2_tot), lambda i: (i, 0)),
            # Constant block index -> these constants are DMAed into VMEM once.
            pl.BlockSpec((d1_tot, t_pad), lambda i: (0, 0)),
            pl.BlockSpec((d2_tot, t_pad), lambda i: (0, 0)),
            pl.BlockSpec((t_pad, dout_pad), lambda i: (0, 0)),
        ],
        out_specs=pl.BlockSpec((tb, dout_pad), lambda i: (i, 0)),
        compiler_params=pltpu.CompilerParams(
            dimension_semantics=("parallel",)),
    )(x1f, x2f, g1, g2, w)

    out = out_pad[:, :dout]               # drop lane padding in the wrapper
    return out.reshape(lead + (dout,))


# --------------------------------------------------------------------------
# Pure-JAX reference (mirrors the PyTorch forward exactly).
# --------------------------------------------------------------------------
def ref_forward(x1, x2, paths, inv):
    lead = x1.shape[:-1]
    chunks = []
    for p in paths:
        xa = x1[..., p["s1"]:p["s1"] + p["mul"] * p["d1"]].reshape(
            lead + (p["mul"], p["d1"]))
        xb = x2[..., p["s2"]:p["s2"] + p["mul"] * p["d2"]].reshape(
            lead + (p["mul"], p["d2"]))
        cg = jnp.asarray(p["cg"], jnp.float32)
        chunk = jnp.einsum("...ui,...uj,ijk->...uk",
                           xa.astype(jnp.float32), xb.astype(jnp.float32), cg)
        chunks.append(chunk.reshape(lead + (p["mul"] * p["d3"],)).astype(x1.dtype))
    return jnp.concatenate([chunks[i] for i in inv], axis=-1)


if __name__ == "__main__":
    # irreps_in1 = "2x0e + 3x1o" (dim 11), irreps_in2 = "2x1e + 3x1o" (dim 15)
    irreps_in1 = [(2, (0, 1)), (3, (1, -1))]
    irreps_in2 = [(2, (1, 1)), (3, (1, -1))]
    # keep only l <= 1 outputs (we hard-code Wigner-3j up to l=1)
    filter_ir_out = [(0, 1), (0, -1), (1, 1), (1, -1)]

    paths, inv, ir1, ir2, ir_out = build_elementwise_tp(
        irreps_in1, irreps_in2, filter_ir_out=filter_ir_out,
        irrep_normalization="component")

    B = 256
    key = jax.random.PRNGKey(0)
    k1, k2 = jax.random.split(key)
    x1 = jax.random.normal(k1, (B, irreps_dim(ir1)), jnp.float32)   # (256, 11)
    x2 = jax.random.normal(k2, (B, irreps_dim(ir2)), jnp.float32)   # (256, 15)

    out = elementwise_tensor_product(x1, x2, paths, inv)
    out = jax.block_until_ready(out)

    ref = jax.block_until_ready(ref_forward(x1, x2, paths, inv))
    np.testing.assert_allclose(np.asarray(out), np.asarray(ref),
                               rtol=1e-4, atol=1e-4)
    assert out.shape == (B, sum(m * irrep_dim(ir) for m, ir in ir_out))
    print("KERNEL_OK")
</pallas_src>

<mosaic_0001>
module attributes {stable_mosaic.version = 11 : i64} {
  func.func @_etp_kernel(%arg0: i32, %arg1: memref<128x11xf32, #tpu.memory_space<vmem>>, %arg2: memref<128x15xf32, #tpu.memory_space<vmem>>, %arg3: memref<11x128xf32, #tpu.memory_space<vmem>>, %arg4: memref<15x128xf32, #tpu.memory_space<vmem>>, %arg5: memref<128x128xf32, #tpu.memory_space<vmem>>, %arg6: memref<128x128xf32, #tpu.memory_space<vmem>>) attributes {dimension_semantics = [#tpu.dimension_semantics<parallel>], iteration_bounds = array<i64: 2>, scalar_prefetch = 0 : i64, scratch_operands = 0 : i64, tpu.core_type = #tpu.core_type<tc>, window_params = [{transform_indices = @transform_0, window_bounds = array<i64: 128, 11>}, {transform_indices = @transform_1, window_bounds = array<i64: 128, 15>}, {pipeline_mode = #tpu.pipeline_mode<synchronous>, transform_indices = @transform_2, window_bounds = array<i64: 11, 128>}, {pipeline_mode = #tpu.pipeline_mode<synchronous>, transform_indices = @transform_3, window_bounds = array<i64: 15, 128>}, {pipeline_mode = #tpu.pipeline_mode<synchronous>, transform_indices = @transform_4, window_bounds = array<i64: 128, 128>}, {transform_indices = @transform_5, window_bounds = array<i64: 128, 128>}]} {
    %c0 = arith.constant 0 : index
    %c0_0 = arith.constant 0 : index
    %0 = vector.load %arg1[%c0, %c0_0] : memref<128x11xf32, #tpu.memory_space<vmem>>, vector<128x11xf32>
    %c0_1 = arith.constant 0 : index
    %c0_2 = arith.constant 0 : index
    %1 = vector.load %arg2[%c0_1, %c0_2] : memref<128x15xf32, #tpu.memory_space<vmem>>, vector<128x15xf32>
    %c0_3 = arith.constant 0 : index
    %c0_4 = arith.constant 0 : index
    %2 = vector.load %arg3[%c0_3, %c0_4] : memref<11x128xf32, #tpu.memory_space<vmem>>, vector<11x128xf32>
    %cst = arith.constant dense<0.000000e+00> : vector<128x128xf32>
    %3 = tpu.matmul %0, %2, %cst {dimension_numbers = #tpu.dot_dimension_numbers<[1], [0], [0], [1], [0, 0, 1, 1], [], []>, precision = #tpu.contract_precision<fp32>} : vector<128x11xf32>, vector<11x128xf32>, vector<128x128xf32> -> vector<128x128xf32>
    %c0_5 = arith.constant 0 : index
    %c0_6 = arith.constant 0 : index
    %4 = vector.load %arg4[%c0_5, %c0_6] : memref<15x128xf32, #tpu.memory_space<vmem>>, vector<15x128xf32>
    %cst_7 = arith.constant dense<0.000000e+00> : vector<128x128xf32>
    %5 = tpu.matmul %1, %4, %cst_7 {dimension_numbers = #tpu.dot_dimension_numbers<[1], [0], [0], [1], [0, 0, 1, 1], [], []>, precision = #tpu.contract_precision<fp32>} : vector<128x15xf32>, vector<15x128xf32>, vector<128x128xf32> -> vector<128x128xf32>
    %6 = arith.mulf %3, %5 : vector<128x128xf32>
    %c0_8 = arith.constant 0 : index
    %c0_9 = arith.constant 0 : index
    %7 = vector.load %arg5[%c0_8, %c0_9] : memref<128x128xf32, #tpu.memory_space<vmem>>, vector<128x128xf32>
    %cst_10 = arith.constant dense<0.000000e+00> : vector<128x128xf32>
    %8 = tpu.matmul %6, %7, %cst_10 {dimension_numbers = #tpu.dot_dimension_numbers<[1], [0], [0], [1], [0, 0, 1, 1], [], []>, precision = #tpu.contract_precision<fp32>} : vector<128x128xf32>, vector<128x128xf32>, vector<128x128xf32> -> vector<128x128xf32>
    %c0_11 = arith.constant 0 : index
    %c0_12 = arith.constant 0 : index
    %9 = vector.load %arg6[%c0_11, %c0_12] : memref<128x128xf32, #tpu.memory_space<vmem>>, vector<128x128xf32>
    tpu.vector_store %arg6[%c0_11, %c0_12], %8 {strides = array<i32>} : memref<128x128xf32, #tpu.memory_space<vmem>>, vector<128x128xf32>,
    return
  }
  func.func @transform_0(%arg0: i32) -> (i32, i32) {
    %c0_i32 = arith.constant 0 : i32
    %c0_i32_0 = arith.constant 0 : i32
    return %arg0, %c0_i32 : i32, i32
  }
  func.func @transform_1(%arg0: i32) -> (i32, i32) {
    %c0_i32 = arith.constant 0 : i32
    %c0_i32_0 = arith.constant 0 : i32
    return %arg0, %c0_i32 : i32, i32
  }
  func.func @transform_2(%arg0: i32) -> (i32, i32) {
    %c0_i32 = arith.constant 0 : i32
    %c0_i32_0 = arith.constant 0 : i32
    %c0_i32_1 = arith.constant 0 : i32
    return %c0_i32, %c0_i32_0 : i32, i32
  }
  func.func @transform_3(%arg0: i32) -> (i32, i32) {
    %c0_i32 = arith.constant 0 : i32
    %c0_i32_0 = arith.constant 0 : i32
    %c0_i32_1 = arith.constant 0 : i32
    return %c0_i32, %c0_i32_0 : i32, i32
  }
  func.func @transform_4(%arg0: i32) -> (i32, i32) {
    %c0_i32 = arith.constant 0 : i32
    %c0_i32_0 = arith.constant 0 : i32
    %c0_i32_1 = arith.constant 0 : i32
    return %c0_i32, %c0_i32_0 : i32, i32
  }
  func.func @transform_5(%arg0: i32) -> (i32, i32) {
    %c0_i32 = arith.constant 0 : i32
    %c0_i32_0 = arith.constant 0 : i32
    return %arg0, %c0_i32 : i32, i32
  }
}

</mosaic_0001>

<bundles_post_ra>
// kernel: tpu_custom_call.1
= control target key start
LH: loop header
LB: loop body
LE: loop exit
PB: predicated region body
PF: predicated region fallthrough
CT: control target
= control target key end

     0   :  { %10 = vsyncpa [#allocation3], 0  ;;  %s7066_s0 = inlined_call_operand.vmem [shape: f32[256,11], index: 0, kind: input, shape index: {}]   ;;  %s7067_s1 = inlined_call_operand.vmem [shape: f32[256,15], index: 1, kind: input, shape index: {}]   ;;  %s7068_s2 = inlined_call_operand.vmem [shape: f32[11,128], index: 2, kind: input, shape index: {}]   ;;  %s7069_s3 = inlined_call_operand.vmem [shape: f32[15,128], index: 3, kind: input, shape index: {}]   ;;  %s7070_s4 = inlined_call_operand.vmem [shape: f32[128,128], index: 4, kind: input, shape index: {}]   ;;  %s7071_s5 = inlined_call_operand.hbm [shape: f32[256,128], index: 5, kind: output, shape index: {}]  }
   0x1   :  { %12 = vsyncpa [#allocation3 + $0x1], 0  ;;  %s5251_s18 = smov 0   ;;  %s5253_s19 = smov 0  }
   0x2   :  { %s5255_s20 = smov 0   ;;  %s5257_s21 = smov 0  }
   0x3 LB: > { %s5272_s22 = sadd.s32 4294967295, %s5216_s21   ;;  %s4020_s23 = sadd.s32 4294967294, %s5216_s21   ;;  %s5216_s21 = sphi %s5257_s21, %s7346_s21   ;;  %s5212_s20 = sphi %s5255_s20, %s7345_s20   ;;  %s5208_s19 = sphi %s5253_s19, %s7344_s19   ;;  %s5204_s18 = sphi %s5251_s18, %s7343_s18  }
   0x4   : > { %s5276_s24 = sadd.s32 1, %s5216_s21   ;;  %s140_s25 = sadd.s32 1, %s5212_s20 }
   0x5   : > { %s137_s26 = ssub.s32 %s5216_s21, %s5276_s24  ;;  %p150_p0 = scmp.ne.s32.totalorder %s5212_s20, %s5208_s19 }
   0x6   : > { %p138_p1 = scmp.eq.s32.totalorder %s137_s26, 0  ;;  %p151_p2 = scmp.eq.s32.totalorder %s5272_s22, 1 }
   0x7   : > { %p156_p3 = scmp.ne.s32.totalorder %s5208_s19, %s5204_s18  ;;  %p157_p4 = scmp.eq.s32.totalorder %s4020_s23, 1 }
   0x8   : > { %s5287_s27 = scalar_select %p138_p1, %s5212_s20, %s140_s25  }
   0x9   : > { %p5289_p5 = por %p151_p2, %p150_p0  ;;  %p5293_p6 = por %p157_p4, %p156_p3 }
   0xa   : > { %p4023_p7 = scmp.ge.s32.totalorder %s5216_s21, 1  ;;  %p202_p8 = scmp.lt.s32.totalorder %s5216_s21, 3 }
   0xc   : > { %p203_p9 = pnand %p4023_p7, %p202_p8 }
   0xe   : > { %206 = sbr.rel (%p203_p9) target bundleno = 745 (0x2e9), region = 40 }
  0x13   : > { %v281_v0 = vld [vmem:[%s7068_s2 + $0x8] sm:$0x7]  ;;  %vm331_vm0 = vcmask 1042432   ;;  %v280_v1 = vld [vmem:[%s7068_s2] sm:$0xff]  ;;  %s4025_s9 = sshll.u32 %s5272_s22, 4  ;;  %vm282_vm1 = vcmask 89088  }
  0x14   : > { %v333_v2 = vsel %vm331_vm0, %v281_v0, 0  ;;  %v5306_v3 = vand.u32 4294901760, %v280_v1  ;;  %p236_p10 = scmp.lt.s32.totalorder %s4025_s9, 31  ;;  %vm1490_vm2 = vcmask 1046528   ;;  %vm1441_vm3 = vcmask 121856   ;;  %s232_s30 = sand.u32 1, %s5208_s19  }
  0x15   : > { %v5308_v4 = vand.u32 4294901760, %v333_v2  ;;  %s4024_s6 = sshll.u32 %s232_s30, 7  ;;  %s4034_s8 = sshll.u32 %s5272_s22, 11 }
  0x16   : > { %v5311_v5 = vsub.f32 %v280_v1, %v5306_v3  ;;  %s7348_s9 = smov (!%p236_p10, %s4025_s9), 31  ;;  %s6958_s7 = scalar_lea.vmem [#allocation2], %s4024_s6 }
  0x17   : > { %4443 = vmatprep.subr.mxu0 %v5308_v4  ;;  %v5317_v6 = vsub.f32 %v333_v2, %v5308_v4  ;;  %s4026_s10 = sshll.u32 %s7348_s9, 3  ;;  %s3946_s9 = sshll.u32 %s6958_s7, 4  ;;  %s7020_s9 = int_to_ptr.vmem [resolvable:$true] %s3946_s9 }
  0x18   : > { %4444 = vmatpush3.msra.mxu0 %v5308_v4  ;;  %v5321_v7 = vand.u32 4294901760, %v5311_v5  ;;  %s5333_s13 = scalar_lea.vmem %s7066_s0, %s4026_s10  ;;  %s5628_s26 = scalar_lea.vmem %s7067_s1, %s4026_s10 }
  0x19   : > { %v5325_v8 = vand.u32 4294901760, %v5317_v6  ;;  %4445 = vmatprep.subr.mxu0 %v5306_v3  ;;  %v248_v10 = vld [vmem:[%s5333_s13] sm:$0xff]  ;;  %v249_v11 = vld [vmem:[%s5333_s13 + $0x8] sm:$0xff]  ;;  %v250_v12 = vld [vmem:[%s5333_s13 + $0x10] sm:$0xff]  ;;  %s7018_s12 = scalar_lea.hbm %s7071_s5, %s4034_s8  ;;  %s7026_s22 = scalar_lea.sflag [#allocation3], %s232_s30 }
  0x1a   : > { %4446 = vmatpush3.msra.mxu0 %v5306_v3  ;;  %v601_v9 = vsub.f32 %v5311_v5, %v5321_v7  ;;  %v284_v14 = vsel %vm282_vm1, %v248_v10, 0  ;;  %v287_v15 = vsel %vm282_vm1, %v249_v11, 0  ;;  %v290_v16 = vsel %vm282_vm1, %v250_v12, 0  ;;  %v251_v17 = vld [vmem:[%s5333_s13 + $0x18] sm:$0xff]  ;;  %v252_v18 = vld [vmem:[%s5333_s13 + $0x20] sm:$0xff]  ;;  %v253_v19 = vld [vmem:[%s5333_s13 + $0x28] sm:$0xff] }
  0x1b   : > { %v594_v13 = vsub.f32 %v5317_v6, %v5325_v8  ;;  %4499 = vmatprep.subr.mxu0 %v5317_v6  ;;  %v5350_v21 = vand.u32 4294901760, %v284_v14  ;;  %v5352_v22 = vand.u32 4294901760, %v287_v15  ;;  %v5354_v23 = vand.u32 4294901760, %v290_v16  ;;  %v254_v24 = vld [vmem:[%s5333_s13 + $0x30] sm:$0xff]  ;;  %v255_v25 = vld [vmem:[%s5333_s13 + $0x38] sm:$0xff]  ;;  %v256_v54 = vld [vmem:[%s5333_s13 + $0x40] sm:$0xff] }
  0x1c   : > { %v602_v20 = vand.u32 4294901760, %v601_v9  ;;  %v293_v27 = vsel %vm282_vm1, %v251_v17, 0  ;;  %v296_v28 = vsel %vm282_vm1, %v252_v18, 0  ;;  %v299_v29 = vsel %vm282_vm1, %v253_v19, 0  ;;  %v257_v55 = vld [vmem:[%s5333_s13 + $0x48] sm:$0xff]  ;;  %v258_v56 = vld [vmem:[%s5333_s13 + $0x50] sm:$0xff] }
  0x1d   : > { %v595_v26 = vand.u32 4294901760, %v594_v13  ;;  %v5362_v30 = vsub.f32 %v284_v14, %v5350_v21  ;;  %4475 = vmatprep.mubr.f32.mxu1 %v5350_v21  ;;  %v5366_v31 = vsub.f32 %v287_v15, %v5352_v22  ;;  %v5369_v32 = vsub.f32 %v290_v16, %v5354_v23  ;;  %v259_v1 = vld [vmem:[%s5333_s13 + $0x58] sm:$0xff]  ;;  %v260_v11 = vld [vmem:[%s5333_s13 + $0x60] sm:$0xff]  ;;  %v261_v16 = vld [vmem:[%s5333_s13 + $0x68] sm:$0xff]  ;;  %s5218_s14 = smov [#allocation2]  }
  0x1e   : > { %v5371_v33 = vand.u32 4294901760, %v293_v27  ;;  %v5373_v34 = vand.u32 4294901760, %v296_v28  ;;  %v5375_v35 = vand.u32 4294901760, %v299_v29  ;;  %v302_v36 = vsel %vm282_vm1, %v254_v24, 0  ;;  %v262_v24 = vld [vmem:[%s5333_s13 + $0x70] sm:$0xff]  ;;  %s5160_s15 = sshll.u32 %s5218_s14, 4  ;;  %s5161_s15 = int_to_ptr.vmem [resolvable:$false] %s5160_s15 }
  0x1f   : > { %4471 = vmatprep.subr.mxu1 %v595_v26  ;;  %v305_v37 = vsel %vm282_vm1, %v255_v25, 0  ;;  %v404_v38 = vand.u32 4294901760, %v5362_v30  ;;  %v414_v39 = vand.u32 4294901760, %v5366_v31  ;;  %v424_v40 = vand.u32 4294901760, %v5369_v32  ;;  %v263_v25 = vld [vmem:[%s5333_s13 + $0x78] sm:$0xff]  ;;  %s5156_s13 = scalar_lea.vmem %s7020_s9, 2048  ;;  %p5163_p0 = scmp.lt.s32.totalorder %s7020_s9, %s5161_s15 }
  0x20   : > { %4472 = vmatpush3.msra.mxu1 %v595_v26  ;;  %v5383_v41 = vsub.f32 %v293_v27, %v5371_v33  ;;  %v5386_v42 = vsub.f32 %v296_v28, %v5373_v34  ;;  %v5389_v43 = vsub.f32 %v299_v29, %v5375_v35  ;;  %v5391_v44 = vand.u32 4294901760, %v302_v36  ;;  %p5157_p11 = scmp.ne.s32.totalorder %s7020_s9, %s5156_s13  ;;  %s5162_s16 = scalar_lea.vmem %s5161_s15, 4096 }
  0x21   : > { %4473 = vmatprep.subr.mxu1 %v602_v20  ;;  %v5393_v45 = vand.u32 4294901760, %v305_v37  ;;  %v405_v46 = vsub.f32 %v5362_v30, %v404_v38  ;;  %v415_v47 = vsub.f32 %v5366_v31, %v414_v39  ;;  %v425_v48 = vsub.f32 %v5369_v32, %v424_v40  ;;  %p5164_p1 = scmp.lt.s32.totalorder %s5162_s16, %s5156_s13 }
  0x22   : > { %4474 = vmatpush3.msra.mxu1 %v602_v20  ;;  %v434_v49 = vand.u32 4294901760, %v5383_v41  ;;  %v444_v50 = vand.u32 4294901760, %v5386_v42  ;;  %v454_v51 = vand.u32 4294901760, %v5389_v43  ;;  %v5410_v52 = vsub.f32 %v302_v36, %v5391_v44  ;;  %p5158_p12 = pnand %p5157_p11, %p5289_p5 }
  0x23   : > { %4476 = vmatmul.mubr.f32.vlgmr.msra.gmra.mxu1 %v5352_v22  ;;  %4527 = vmatprep.subr.mxu1 %v5308_v4  ;;  %v5413_v53 = vsub.f32 %v305_v37, %v5393_v45  ;;  %v406_v57 = vand.u32 4294901760, %v405_v46  ;;  %v416_v58 = vand.u32 4294901760, %v415_v47  ;;  %v426_v59 = vand.u32 4294901760, %v425_v48  ;;  %p5165_p2 = por %p5164_p1, %p5163_p0 }
  0x24   : > { %4528 = vmatpush3.msra.mxu1 %v5308_v4  ;;  %4478 = vmatprep.mubr.f32.mxu1 %v5354_v23  ;;  %v435_v60 = vsub.f32 %v5383_v41, %v434_v49  ;;  %v445_v61 = vsub.f32 %v5386_v42, %v444_v50  ;;  %v455_v62 = vsub.f32 %v5389_v43, %v454_v51  ;;  %v464_v63 = vand.u32 4294901760, %v5410_v52  ;;  %p5159_p13 = pneg %p5158_p12 }
  0x25   : > { %v474_v0 = vand.u32 4294901760, %v5413_v53  ;;  %4529 = vmatprep.subr.mxu1 %v5306_v3  ;;  %4447 = vmatprep.mubr.f32.mxu0 %v406_v57  ;;  %v308_v2 = vsel %vm282_vm1, %v256_v54, 0  ;;  %v311_v9 = vsel %vm282_vm1, %v257_v55, 0  ;;  %v314_v10 = vsel %vm282_vm1, %v258_v56, 0 }
  0x26   : > { %4530 = vmatpush3.msra.mxu1 %v5306_v3  ;;  %4448 = vmatmul.mubr.f32.vlgmr.msra.gmra.mxu0 %v416_v58  ;;  %v436_v12 = vand.u32 4294901760, %v435_v60  ;;  %v446_v13 = vand.u32 4294901760, %v445_v61  ;;  %v456_v14 = vand.u32 4294901760, %v455_v62  ;;  %v465_v15 = vsub.f32 %v5410_v52, %v464_v63  ;;  %p5166_p3 = pnand %p5165_p2, %p5159_p13 }
  0x27   : > { %4479 = vmatmul.mubr.f32.gmra.mxu1 %v5371_v33  ;;  %4500 = vmatpush3.msra.mxu0 %v5317_v6  ;;  %v5444_v17 = vand.u32 4294901760, %v308_v2  ;;  %v5446_v18 = vand.u32 4294901760, %v311_v9  ;;  %v5448_v19 = vand.u32 4294901760, %v314_v10  ;;  %v317_v20 = vsel %vm282_vm1, %v259_v1, 0 }
  0x28   : > { %4450 = vmatprep.mubr.f32.mxu0 %v426_v59  ;;  %4481 = vmatprep.mubr.f32.mxu1 %v5373_v34  ;;  %v466_v26 = vand.u32 4294901760, %v465_v15  ;;  %v475_v27 = vsub.f32 %v5413_v53, %v474_v0  ;;  %v5458_v6 = vand.u32 4294901760, %v317_v20  ;;  %v320_v28 = vsel %vm282_vm1, %v260_v11, 0  ;;  %v1440_v11 = vld [vmem:[%s7069_s3 + $0x8] sm:$0x7f] }
  0x29   : > { %4501 = vmatprep.subr.mxu0 %v5311_v5  ;;  %v5462_v29 = vsub.f32 %v308_v2, %v5444_v17  ;;  %v5465_v36 = vsub.f32 %v311_v9, %v5446_v18  ;;  %v5469_v37 = vsub.f32 %v314_v10, %v5448_v19  ;;  %v5471_v46 = vand.u32 4294901760, %v320_v28  ;;  %4583 = vmatprep.subr.mxu1 %v5308_v4 }
  0x2a   : > { %4502 = vmatpush3.msra.mxu0 %v5311_v5  ;;  %v5476_v47 = vsub.f32 %v317_v20, %v5458_v6  ;;  %v323_v48 = vsel %vm282_vm1, %v261_v16, 0  ;;  %v326_v54 = vsel %vm282_vm1, %v262_v24, 0  ;;  %v329_v55 = vsel %vm282_vm1, %v263_v25, 0 }
  0x2b   : > { %4451 = vmatmul.mubr.f32.gmra.mxu0 %v436_v12  ;;  %4482 = vmatmul.mubr.f32.gmra.mxu1 %v5375_v35  ;;  %v484_v5 = vand.u32 4294901760, %v5462_v29  ;;  %v494_v56 = vand.u32 4294901760, %v5465_v36  ;;  %v504_v57 = vand.u32 4294901760, %v5469_v37  ;;  %v5486_v58 = vsub.f32 %v320_v28, %v5471_v46 }
  0x2c   : > { %4453 = vmatprep.mubr.f32.mxu0 %v446_v13  ;;  %4484 = vmatprep.mubr.f32.mxu1 %v5391_v44  ;;  %v5488_v59 = vand.u32 4294901760, %v323_v48  ;;  %v5490_v60 = vand.u32 4294901760, %v326_v54  ;;  %v476_v61 = vand.u32 4294901760, %v475_v27  ;;  %v514_v2 = vand.u32 4294901760, %v5476_v47 }
  0x2d   : > { %4555 = vmatprep.subr.mxu0 %v5325_v8  ;;  %v485_v62 = vsub.f32 %v5462_v29, %v484_v5  ;;  %v495_v1 = vsub.f32 %v5465_v36, %v494_v56  ;;  %v5504_v10 = vand.u32 4294901760, %v329_v55  ;;  %v505_v13 = vsub.f32 %v5469_v37, %v504_v57 }
  0x2e   : > { %v5502_v9 = vsub.f32 %v323_v48, %v5488_v59  ;;  %v5515_v15 = vsub.f32 %v326_v54, %v5490_v60  ;;  %v1492_v16 = vsel %vm1490_vm2, %v1440_v11, 0  ;;  %v515_v24 = vsub.f32 %v5476_v47, %v514_v2 }
  0x2f   : > { %4454 = vmatmul.mubr.f32.gmra.mxu0 %v456_v14  ;;  %4485 = vmatmul.mubr.f32.gmra.mxu1 %v5393_v45  ;;  %v486_v12 = vand.u32 4294901760, %v485_v62  ;;  %v524_v14 = vand.u32 4294901760, %v5486_v58  ;;  %v496_v20 = vand.u32 4294901760, %v495_v1  ;;  %v506_v27 = vand.u32 4294901760, %v505_v13 }
  0x30   : > { %4456 = vmatprep.mubr.f32.mxu0 %v466_v26  ;;  %4487 = vmatprep.mubr.f32.mxu1 %v5444_v17  ;;  %v534_v25 = vand.u32 4294901760, %v5502_v9  ;;  %v5523_v26 = vsub.f32 %v329_v55, %v5504_v10  ;;  %v544_v48 = vand.u32 4294901760, %v5515_v15  ;;  %v5530_v54 = vand.u32 4294901760, %v1492_v16 }
  0x31   : > { %v525_v28 = vsub.f32 %v5486_v58, %v524_v14 }
  0x32   : > { %v535_v55 = vsub.f32 %v5502_v9, %v534_v25  ;;  %v554_v62 = vand.u32 4294901760, %v5523_v26  ;;  %v545_v11 = vsub.f32 %v5515_v15, %v544_v48 }
  0x33   : > { %4457 = vmatmul.mubr.f32.gmra.mxu0 %v476_v61  ;;  %4488 = vmatmul.mubr.f32.gmra.mxu1 %v5446_v18  ;;  %v516_v61 = vand.u32 4294901760, %v515_v24  ;;  %v526_v1 = vand.u32 4294901760, %v525_v28 }
  0x34   : > { %4459 = vmatprep.mubr.f32.mxu0 %v486_v12  ;;  %4490 = vmatprep.mubr.f32.mxu1 %v5448_v19  ;;  %v5542_v12 = vsub.f32 %v1492_v16, %v5530_v54  ;;  %v536_v13 = vand.u32 4294901760, %v535_v55  ;;  %v546_v24 = vand.u32 4294901760, %v545_v11 }
  0x37   : > { %4460 = vmatmul.mubr.f32.gmra.mxu0 %v496_v20  ;;  %4491 = vmatmul.mubr.f32.gmra.mxu1 %v5458_v6  ;;  %v555_v20 = vsub.f32 %v5523_v26, %v554_v62 }
  0x38   : > { %4462 = vmatprep.mubr.f32.mxu0 %v506_v27  ;;  %4493 = vmatprep.mubr.f32.mxu1 %v5471_v46  ;;  %v5548_v27 = vand.u32 4294901760, %v5542_v12 }
  0x39   : > { %v556_v28 = vand.u32 4294901760, %v555_v20 }
  0x3a   : > { %v1753_v16 = vsub.f32 %v5542_v12, %v5548_v27 }
  0x3b   : > { %4463 = vmatmul.mubr.f32.gmra.mxu0 %v516_v61  ;;  %4494 = vmatmul.mubr.f32.gmra.mxu1 %v5488_v59 }
  0x3c   : > { %4465 = vmatprep.mubr.f32.mxu0 %v526_v1  ;;  %4496 = vmatprep.mubr.f32.mxu1 %v5490_v60  ;;  %v1754_v61 = vand.u32 4294901760, %v1753_v16 }
  0x3f   : > { %4466 = vmatmul.mubr.f32.gmra.mxu0 %v536_v13  ;;  %4497 = vmatmul.mubr.f32.gmra.mxu1 %v5504_v10  ;;  %v275_v13 = vld [vmem:[%s5628_s26 + $0x58] sm:$0xff] }
  0x40   : > { %4468 = vmatprep.mubr.f32.mxu0 %v546_v24  ;;  %4531 = vmatprep.mubr.f32.mxu1 %v404_v38 }
  0x43   : > { %4469 = vmatmul.mubr.f32.gmra.mxu0 %v556_v28  ;;  %4532 = vmatmul.mubr.f32.vlgmr.msra.gmra.mxu1 %v414_v39  ;;  %v267_v39 = vld [vmem:[%s5628_s26 + $0x18] sm:$0xff]  ;;  %v276_v28 = vld [vmem:[%s5628_s26 + $0x60] sm:$0xff] }
  0x44   : > { %4503 = vmatprep.mubr.f32.mxu0 %v5362_v30  ;;  %4584 = vmatpush3.msra.mxu1 %v5308_v4 }
  0x45   : > { %4534 = vmatprep.mubr.f32.mxu1 %v424_v40  ;;  %4585 = vmatprep.subr.mxu1 %v5306_v3  ;;  %v268_v40 = vld [vmem:[%s5628_s26 + $0x20] sm:$0xff] }
  0x46   : > { %4586 = vmatpush3.msra.mxu1 %v5306_v3  ;;  %v1439_v3 = vld [vmem:[%s7069_s3] sm:$0xff] }
  0x47   : > { %4504 = vmatmul.mubr.f32.vlgmr.msra.gmra.mxu0 %v5366_v31  ;;  %4535 = vmatmul.mubr.f32.gmra.mxu1 %v434_v49  ;;  %v5588_v4 = vand.u32 4294901760, %v1439_v3  ;;  %v270_v49 = vld [vmem:[%s5628_s26 + $0x30] sm:$0xff] }
  0x48   : > { %4556 = vmatpush3.msra.mxu0 %v5325_v8  ;;  %4506 = vmatprep.mubr.f32.mxu0 %v5369_v32  ;;  %v266_v32 = vld [vmem:[%s5628_s26 + $0x10] sm:$0xff] }
  0x49   : > { %4537 = vmatprep.mubr.f32.mxu1 %v444_v50  ;;  %4557 = vmatprep.subr.mxu0 %v5321_v7  ;;  %v1449_v38 = vsel %vm1441_vm3, %v266_v32, 0  ;;  %v277_v32 = vld [vmem:[%s5628_s26 + $0x68] sm:$0xff] }
  0x4a   : > { %4558 = vmatpush3.msra.mxu0 %v5321_v7  ;;  %4639 = vmatprep.subr.mxu1 %v1754_v61  ;;  %v5597_v7 = vsub.f32 %v1439_v3, %v5588_v4 }
  0x4b   : > { %4507 = vmatmul.mubr.f32.gmra.mxu0 %v5383_v41  ;;  %4538 = vmatmul.mubr.f32.gmra.mxu1 %v454_v51 }
  0x4c   : > { %4509 = vmatprep.mubr.f32.mxu0 %v5386_v42  ;;  %4540 = vmatprep.mubr.f32.mxu1 %v464_v63  ;;  %v5606_v8 = vand.u32 4294901760, %v5597_v7  ;;  %v5666_v42 = vand.u32 4294901760, %v1449_v38 }
  0x4d   : > { %4611 = vmatprep.subr.mxu0 %v5530_v54 }
  0x4e   : > { %v1760_v30 = vsub.f32 %v5597_v7, %v5606_v8 }
  0x4f   : > { %4510 = vmatmul.mubr.f32.gmra.mxu0 %v5389_v43  ;;  %4541 = vmatmul.mubr.f32.gmra.mxu1 %v474_v0  ;;  %v1452_v43 = vsel %vm1441_vm3, %v267_v39, 0  ;;  %v5685_v0 = vsub.f32 %v1449_v38, %v5666_v42 }
  0x50   : > { %4512 = vmatprep.mubr.f32.mxu0 %v5410_v52  ;;  %4543 = vmatprep.mubr.f32.mxu1 %v484_v5  ;;  %v1761_v31 = vand.u32 4294901760, %v1760_v30  ;;  %v5677_v51 = vand.u32 4294901760, %v1452_v43 }
  0x53   : > { %4513 = vmatmul.mubr.f32.gmra.mxu0 %v5413_v53  ;;  %4544 = vmatmul.mubr.f32.gmra.mxu1 %v494_v56  ;;  %v1461_v53 = vsel %vm1441_vm3, %v270_v49, 0 }
  0x54   : > { %4515 = vmatprep.mubr.f32.mxu0 %v5462_v29  ;;  %4546 = vmatprep.mubr.f32.mxu1 %v504_v57  ;;  %v272_v29 = vld [vmem:[%s5628_s26 + $0x40] sm:$0xff]  ;;  %v1583_v57 = vand.u32 4294901760, %v5685_v0 }
  0x57   : > { %4516 = vmatmul.mubr.f32.gmra.mxu0 %v5465_v36  ;;  %4547 = vmatmul.mubr.f32.gmra.mxu1 %v514_v2  ;;  %v273_v2 = vld [vmem:[%s5628_s26 + $0x48] sm:$0xff] }
  0x58   : > { %4518 = vmatprep.mubr.f32.mxu0 %v5469_v37  ;;  %4549 = vmatprep.mubr.f32.mxu1 %v524_v14  ;;  %v5693_v37 = vand.u32 4294901760, %v1461_v53  ;;  %v1470_v1 = vsel %vm1441_vm3, %v273_v2, 0 }
  0x59   : > { %v5753_v30 = vand.u32 4294901760, %v1470_v1 }
  0x5b   : > { %4519 = vmatmul.mubr.f32.gmra.mxu0 %v5476_v47  ;;  %4550 = vmatmul.mubr.f32.gmra.mxu1 %v534_v25  ;;  %v5699_v47 = vsub.f32 %v1452_v43, %v5677_v51  ;;  %v5778_v49 = vsub.f32 %v1470_v1, %v5753_v30 }
  0x5c   : > { %4521 = vmatprep.mubr.f32.mxu0 %v5486_v58  ;;  %4552 = vmatprep.mubr.f32.mxu1 %v544_v48  ;;  %v1467_v58 = vsel %vm1441_vm3, %v272_v29, 0  ;;  %v1482_v29 = vsel %vm1441_vm3, %v277_v32, 0 }
  0x5d   : > { %v5728_v48 = vand.u32 4294901760, %v1467_v58 }
  0x5f   : > { %4522 = vmatmul.mubr.f32.gmra.mxu0 %v5502_v9  ;;  %4553 = vmatmul.mubr.f32.gmra.mxu1 %v554_v62  ;;  %v5751_v3 = vsub.f32 %v1467_v58, %v5728_v48 }
  0x60   : > { %4524 = vmatprep.mubr.f32.mxu0 %v5515_v15  ;;  %4587 = vmatprep.mubr.f32.mxu1 %v5350_v21  ;;  %v274_v15 = vld [vmem:[%s5628_s26 + $0x50] sm:$0xff] }
  0x61   : > { %v1473_v11 = vsel %vm1441_vm3, %v274_v15, 0 }
  0x63   : > { %4525 = vmatmul.mubr.f32.gmra.mxu0 %v5523_v26  ;;  %4588 = vmatmul.mubr.f32.vlgmr.msra.gmra.mxu1 %v5352_v22  ;;  %v1593_v26 = vand.u32 4294901760, %v5699_v47 }
  0x64   : > { %4559 = vmatprep.mubr.f32.mxu0 %v5350_v21  ;;  %4640 = vmatpush3.msra.mxu1 %v1754_v61  ;;  %v264_v21 = vld [vmem:[%s5628_s26] sm:$0xff] }
  0x65   : > { %4590 = vmatprep.mubr.f32.mxu1 %v5354_v23  ;;  %4641 = vmatprep.subr.mxu1 %v1761_v31  ;;  %v1594_v61 = vsub.f32 %v5699_v47, %v1593_v26 }
  0x66   : > { %4642 = vmatpush3.msra.mxu1 %v1761_v31 }
  0x67   : > { %4560 = vmatmul.mubr.f32.vlgmr.msra.gmra.mxu0 %v5352_v22  ;;  %4591 = vmatmul.mubr.f32.gmra.mxu1 %v5371_v33  ;;  %v1443_v22 = vsel %vm1441_vm3, %v264_v21, 0  ;;  %v5759_v21 = vand.u32 4294901760, %v1473_v11  ;;  %v1595_v43 = vand.u32 4294901760, %v1594_v61 }
  0x68   : > { %4612 = vmatpush3.msra.mxu0 %v5530_v54  ;;  %4562 = vmatprep.mubr.f32.mxu0 %v5354_v23  ;;  %v265_v23 = vld [vmem:[%s5628_s26 + $0x8] sm:$0xff] }
  0x69   : > { %4593 = vmatprep.mubr.f32.mxu1 %v5373_v34  ;;  %4613 = vmatprep.subr.mxu0 %v5588_v4 }
  0x6a   : > { %4614 = vmatpush3.msra.mxu0 %v5588_v4  ;;  %4695 = vmatprep.subr.mxu1 %v5530_v54 }
  0x6b   : > { %4563 = vmatmul.mubr.f32.gmra.mxu0 %v5371_v33  ;;  %4594 = vmatmul.mubr.f32.gmra.mxu1 %v5375_v35  ;;  %v5651_v33 = vand.u32 4294901760, %v1443_v22 }
  0x6c   : > { %4565 = vmatprep.mubr.f32.mxu0 %v5373_v34  ;;  %4596 = vmatprep.mubr.f32.mxu1 %v5391_v44  ;;  %v1446_v34 = vsel %vm1441_vm3, %v265_v23, 0  ;;  %v1479_v23 = vsel %vm1441_vm3, %v276_v28, 0 }
  0x6d   : > { %4667 = vmatprep.subr.mxu0 %v5542_v12  ;;  %v5664_v41 = vsub.f32 %v1443_v22, %v5651_v33  ;;  %v1476_v22 = vsel %vm1441_vm3, %v275_v13, 0 }
  0x6f   : > { %4566 = vmatmul.mubr.f32.gmra.mxu0 %v5375_v35  ;;  %4597 = vmatmul.mubr.f32.gmra.mxu1 %v5393_v45  ;;  %v5659_v35 = vand.u32 4294901760, %v1446_v34  ;;  %v1563_v63 = vand.u32 4294901760, %v5664_v41 }
  0x70   : > { %4568 = vmatprep.mubr.f32.mxu0 %v5391_v44  ;;  %4599 = vmatprep.mubr.f32.mxu1 %v5444_v17  ;;  %v269_v44 = vld [vmem:[%s5628_s26 + $0x28] sm:$0xff] }
  0x71   : > { %v5675_v50 = vsub.f32 %v1446_v34, %v5659_v35  ;;  %v1458_v52 = vsel %vm1441_vm3, %v269_v44, 0  ;;  %v1564_v56 = vsub.f32 %v5664_v41, %v1563_v63  ;;  %v1643_v44 = vand.u32 4294901760, %v5751_v3 }
  0x72   : > { %v5691_v36 = vand.u32 4294901760, %v1458_v52 }
  0x73   : > { %4569 = vmatmul.mubr.f32.gmra.mxu0 %v5393_v45  ;;  %4600 = vmatmul.mubr.f32.gmra.mxu1 %v5446_v18  ;;  %v1455_v45 = vsel %vm1441_vm3, %v268_v40, 0  ;;  %v1565_v55 = vand.u32 4294901760, %v1564_v56  ;;  %v278_v40 = vld [vmem:[%s5628_s26 + $0x70] sm:$0xff]  ;;  %v279_v56 = vld [vmem:[%s5628_s26 + $0x78] sm:$0xff]  ;;  %v1644_v15 = vsub.f32 %v5751_v3, %v1643_v44 }
  0x74   : > { %4571 = vmatprep.mubr.f32.mxu0 %v5444_v17  ;;  %4602 = vmatprep.mubr.f32.mxu1 %v5448_v19  ;;  %v5687_v17 = vand.u32 4294901760, %v1455_v45  ;;  %v5714_v9 = vsub.f32 %v1458_v52, %v5691_v36  ;;  %v1488_v13 = vsel %vm1441_vm3, %v279_v56, 0 }
  0x76   : > { %v1613_v20 = vand.u32 4294901760, %v5714_v9 }
  0x77   : > { %4572 = vmatmul.mubr.f32.gmra.mxu0 %v5446_v18  ;;  %4603 = vmatmul.mubr.f32.gmra.mxu1 %v5458_v6  ;;  %v271_v18 = vld [vmem:[%s5628_s26 + $0x38] sm:$0xff] }
  0x78   : > { %4574 = vmatprep.mubr.f32.mxu0 %v5448_v19  ;;  %4605 = vmatprep.mubr.f32.mxu1 %v5471_v46  ;;  %v1573_v19 = vand.u32 4294901760, %v5675_v50  ;;  %v1464_v5 = vsel %vm1441_vm3, %v271_v18, 0  ;;  %v1614_v34 = vsub.f32 %v5714_v9, %v1613_v20  ;;  %v5786_v18 = vand.u32 4294901760, %v1479_v23 }
  0x79   : > { %v5719_v14 = vand.u32 4294901760, %v1464_v5 }
  0x7a   : > { %v1574_v25 = vsub.f32 %v5675_v50, %v1573_v19  ;;  %v1615_v58 = vand.u32 4294901760, %v1614_v34  ;;  %v5811_v1 = vsub.f32 %v1479_v23, %v5786_v18 }
  0x7b   : > { %4575 = vmatmul.mubr.f32.gmra.mxu0 %v5458_v6  ;;  %4606 = vmatmul.mubr.f32.gmra.mxu1 %v5488_v59  ;;  %v5709_v6 = vsub.f32 %v1455_v45, %v5687_v17  ;;  %v5780_v45 = vand.u32 4294901760, %v1476_v22 }
  0x7c   : > { %4577 = vmatprep.mubr.f32.mxu0 %v5471_v46  ;;  %4608 = vmatprep.mubr.f32.mxu1 %v5490_v60  ;;  %v5717_v46 = vsub.f32 %v1461_v53, %v5693_v37  ;;  %v1575_v16 = vand.u32 4294901760, %v1574_v25  ;;  %v5784_v53 = vsub.f32 %v1473_v11, %v5759_v21  ;;  %v1653_v25 = vand.u32 4294901760, %v5778_v49 }
  0x7d   : > { %v1603_v62 = vand.u32 4294901760, %v5709_v6  ;;  %v1683_v32 = vand.u32 4294901760, %v5811_v1 }
  0x7e   : > { %v1623_v24 = vand.u32 4294901760, %v5717_v46 }
  0x7f   : > { %4578 = vmatmul.mubr.f32.gmra.mxu0 %v5488_v59  ;;  %4609 = vmatmul.mubr.f32.gmra.mxu1 %v5504_v10  ;;  %v1584_v59 = vsub.f32 %v5685_v0, %v1583_v57 }
  0x80   : > { %4580 = vmatprep.mubr.f32.mxu0 %v5490_v60  ;;  %4643 = vmatprep.mubr.f32.mxu1 %v5651_v33  ;;  %v5742_v60 = vsub.f32 %v1464_v5, %v5719_v14  ;;  %v1624_v38 = vsub.f32 %v5717_v46, %v1623_v24  ;;  %v1485_v5 = vsel %vm1441_vm3, %v278_v40, 0 }
  0x81   : > { %v1585_v31 = vand.u32 4294901760, %v1584_v59  ;;  %v5806_v59 = vand.u32 4294901760, %v1482_v29  ;;  %v5813_v11 = vand.u32 4294901760, %v1485_v5 }
  0x82   : > { %v1633_v39 = vand.u32 4294901760, %v5742_v60  ;;  %v1625_v2 = vand.u32 4294901760, %v1624_v38 }
  0x83   : > { %4581 = vmatmul.mubr.f32.gmra.mxu0 %v5504_v10  ;;  %4644 = vmatmul.mubr.f32.vlgmr.msra.gmra.mxu1 %v5659_v35  ;;  %v1604_v10 = vsub.f32 %v5709_v6, %v1603_v62  ;;  %v5833_v34 = vsub.f32 %v1485_v5, %v5813_v11  ;;  %v1684_v5 = vsub.f32 %v5811_v1, %v1683_v32 }
  0x84   : > { %4615 = vmatprep.mubr.f32.mxu0 %v1565_v55  ;;  %4696 = vmatpush3.msra.mxu1 %v5530_v54  ;;  %v5804_v55 = vsub.f32 %v1476_v22, %v5780_v45  ;;  %v1645_v22 = vand.u32 4294901760, %v1644_v15 }
  0x85   : > { %4646 = vmatprep.mubr.f32.mxu1 %v5666_v42  ;;  %4697 = vmatprep.subr.mxu1 %v5588_v4  ;;  %v1605_v52 = vand.u32 4294901760, %v1604_v10  ;;  %v5825_v10 = vand.u32 4294901760, %v1488_v13  ;;  %v1703_v56 = vand.u32 4294901760, %v5833_v34  ;;  %v1685_v15 = vand.u32 4294901760, %v1684_v5 }
  0x86   : > { %4698 = vmatpush3.msra.mxu1 %v5588_v4  ;;  %v1673_v61 = vand.u32 4294901760, %v5804_v55 }
  0x87   : > { %4616 = vmatmul.mubr.f32.vlgmr.msra.gmra.mxu0 %v1575_v16  ;;  %4647 = vmatmul.mubr.f32.gmra.mxu1 %v5677_v51  ;;  %v1654_v16 = vsub.f32 %v5778_v49, %v1653_v25 }
  0x88   : > { %4668 = vmatpush3.msra.mxu0 %v5542_v12  ;;  %4618 = vmatprep.mubr.f32.mxu0 %v1585_v31  ;;  %v1634_v12 = vsub.f32 %v5742_v60, %v1633_v39  ;;  %v5823_v31 = vsub.f32 %v1482_v29, %v5806_v59  ;;  %v1674_v40 = vsub.f32 %v5804_v55, %v1673_v61 }
  0x89   : > { %4649 = vmatprep.mubr.f32.mxu1 %v5687_v17  ;;  %4669 = vmatprep.subr.mxu0 %v5597_v7  ;;  %v1655_v38 = vand.u32 4294901760, %v1654_v16 }
  0x8a   : > { %4670 = vmatpush3.msra.mxu0 %v5597_v7  ;;  %4751 = vmatprep.subr.mxu1 %v5530_v54  ;;  %v1663_v7 = vand.u32 4294901760, %v5784_v53  ;;  %v1635_v28 = vand.u32 4294901760, %v1634_v12 }
  0x8b   : > { %4619 = vmatmul.mubr.f32.gmra.mxu0 %v1595_v43  ;;  %4650 = vmatmul.mubr.f32.gmra.mxu1 %v5691_v36  ;;  %v1693_v43 = vand.u32 4294901760, %v5823_v31 }
  0x8c   : > { %4621 = vmatprep.mubr.f32.mxu0 %v1605_v52  ;;  %4652 = vmatprep.mubr.f32.mxu1 %v5693_v37  ;;  %v1664_v23 = vsub.f32 %v5784_v53, %v1663_v7  ;;  %v5841_v52 = vsub.f32 %v1488_v13, %v5825_v10  ;;  %v1704_v13 = vsub.f32 %v5833_v34, %v1703_v56 }
  0x8d   : > { %4723 = vmatprep.subr.mxu0 %v5548_v27 }
  0x8e   : > { %v1665_v29 = vand.u32 4294901760, %v1664_v23  ;;  %v1713_v12 = vand.u32 4294901760, %v5841_v52 }
  0x8f   : > { %4622 = vmatmul.mubr.f32.gmra.mxu0 %v1615_v58  ;;  %4653 = vmatmul.mubr.f32.gmra.mxu1 %v5719_v14  ;;  %v1675_v58 = vand.u32 4294901760, %v1674_v40 }
  0x90   : > { %4624 = vmatprep.mubr.f32.mxu0 %v1625_v2  ;;  %4655 = vmatprep.mubr.f32.mxu1 %v5728_v48  ;;  %v1694_v2 = vsub.f32 %v5823_v31, %v1693_v43  ;;  %v1714_v16 = vsub.f32 %v5841_v52, %v1713_v12 }
  0x92   : > { %v1715_v23 = vand.u32 4294901760, %v1714_v16 }
  0x93   : > { %4625 = vmatmul.mubr.f32.gmra.mxu0 %v1635_v28  ;;  %4656 = vmatmul.mubr.f32.gmra.mxu1 %v5753_v30  ;;  %v1695_v28 = vand.u32 4294901760, %v1694_v2 }
  0x94   : > { %4627 = vmatprep.mubr.f32.mxu0 %v1645_v22  ;;  %4658 = vmatprep.mubr.f32.mxu1 %v5759_v21  ;;  %v1705_v22 = vand.u32 4294901760, %v1704_v13 }
  0x97   : > { %4628 = vmatmul.mubr.f32.gmra.mxu0 %v1655_v38  ;;  %4659 = vmatmul.mubr.f32.gmra.mxu1 %v5780_v45 }
  0x98   : > { %4630 = vmatprep.mubr.f32.mxu0 %v1665_v29  ;;  %4661 = vmatprep.mubr.f32.mxu1 %v5786_v18 }
  0x9b   : > { %4631 = vmatmul.mubr.f32.gmra.mxu0 %v1675_v58  ;;  %4662 = vmatmul.mubr.f32.gmra.mxu1 %v5806_v59 }
  0x9c   : > { %4633 = vmatprep.mubr.f32.mxu0 %v1685_v15  ;;  %4664 = vmatprep.mubr.f32.mxu1 %v5813_v11 }
  0x9f   : > { %4634 = vmatmul.mubr.f32.gmra.mxu0 %v1695_v28  ;;  %4665 = vmatmul.mubr.f32.gmra.mxu1 %v5825_v10 }
  0xa0   : > { %4636 = vmatprep.mubr.f32.mxu0 %v1705_v22  ;;  %4699 = vmatprep.mubr.f32.mxu1 %v1563_v63 }
  0xa3   : > { %4637 = vmatmul.mubr.f32.gmra.mxu0 %v1715_v23  ;;  %4700 = vmatmul.mubr.f32.vlgmr.msra.gmra.mxu1 %v1573_v19  ;;  %v2627_v19 = vld [vmem:[%s7070_s4 + $0x68] sm:$0xff]  ;;  %v2621_v23 = vld [vmem:[%s7070_s4 + $0x38] sm:$0xff] }
  0xa4   : > { %4671 = vmatprep.mubr.f32.mxu0 %v5664_v41  ;;  %4752 = vmatpush3.msra.mxu1 %v5530_v54 }
  0xa5   : > { %4702 = vmatprep.mubr.f32.mxu1 %v1583_v57  ;;  %4753 = vmatprep.subr.mxu1 %v5588_v4 }
  0xa6   : > { %4754 = vmatpush3.msra.mxu1 %v5588_v4 }
  0xa7   : > { %4672 = vmatmul.mubr.f32.vlgmr.msra.gmra.mxu0 %v5675_v50  ;;  %4703 = vmatmul.mubr.f32.gmra.mxu1 %v1593_v26 }
  0xa8   : > { %4724 = vmatpush3.msra.mxu0 %v5548_v27  ;;  %4674 = vmatprep.mubr.f32.mxu0 %v5685_v0 }
  0xa9   : > { %4705 = vmatprep.mubr.f32.mxu1 %v1603_v62  ;;  %4725 = vmatprep.subr.mxu0 %v5606_v8 }
  0xaa   : > { %4726 = vmatpush3.msra.mxu0 %v5606_v8 }
  0xab   : > { %4675 = vmatmul.mubr.f32.gmra.mxu0 %v5699_v47  ;;  %4706 = vmatmul.mubr.f32.gmra.mxu1 %v1613_v20 }
  0xac   : > { %4677 = vmatprep.mubr.f32.mxu0 %v5709_v6  ;;  %4708 = vmatprep.mubr.f32.mxu1 %v1623_v24 }
  0xaf   : > { %4678 = vmatmul.mubr.f32.gmra.mxu0 %v5714_v9  ;;  %4709 = vmatmul.mubr.f32.gmra.mxu1 %v1633_v39 }
  0xb0   : > { %4680 = vmatprep.mubr.f32.mxu0 %v5717_v46  ;;  %4711 = vmatprep.mubr.f32.mxu1 %v1643_v44  ;;  %v5971_v46 = vand.u32 4294901760, %v2627_v19 }
  0xb2   : > { %7182 = vst [vmem:[#allocation10_spill] sm:$0xff] %v5971_v46  ;;  %v5984_v24 = vsub.f32 %v2627_v19, %v5971_v46  ;;  %v2620_v19 = vld [vmem:[%s7070_s4 + $0x30] sm:$0xff] }
  0xb3   : > { %4681 = vmatmul.mubr.f32.gmra.mxu0 %v5742_v60  ;;  %4712 = vmatmul.mubr.f32.gmra.mxu1 %v1653_v25  ;;  %v2624_v25 = vld [vmem:[%s7070_s4 + $0x50] sm:$0xff] }
  0xb4   : > { %4683 = vmatprep.mubr.f32.mxu0 %v5751_v3  ;;  %4714 = vmatprep.mubr.f32.mxu1 %v1663_v7  ;;  %7184 = vst [vmem:[#allocation12_spill] sm:$0xff] %v5984_v24 }
  0xb7   : > { %4684 = vmatmul.mubr.f32.gmra.mxu0 %v5778_v49  ;;  %4715 = vmatmul.mubr.f32.gmra.mxu1 %v1673_v61  ;;  %v6019_v61 = vand.u32 4294901760, %v2624_v25 }
  0xb8   : > { %4686 = vmatprep.mubr.f32.mxu0 %v5784_v53  ;;  %4717 = vmatprep.mubr.f32.mxu1 %v1683_v32  ;;  %v2623_v32 = vld [vmem:[%s7070_s4 + $0x48] sm:$0xff] }
  0xb9   : > { %7190 = vst [vmem:[#allocation18_spill] sm:$0xff] %v6019_v61  ;;  %v6039_v29 = vand.u32 4294901760, %v2623_v32 }
  0xbb   : > { %4687 = vmatmul.mubr.f32.gmra.mxu0 %v5804_v55  ;;  %4718 = vmatmul.mubr.f32.gmra.mxu1 %v1693_v43  ;;  %7193 = vst [vmem:[#allocation21_spill] sm:$0xff] %v6039_v29  ;;  %v6053_v13 = vsub.f32 %v2623_v32, %v6039_v29 }
  0xbc   : > { %4689 = vmatprep.mubr.f32.mxu0 %v5811_v1  ;;  %4720 = vmatprep.mubr.f32.mxu1 %v1703_v56  ;;  %v2622_v56 = vld [vmem:[%s7070_s4 + $0x40] sm:$0xff] }
  0xbd   : > { %7196 = vst [vmem:[#allocation24_spill] sm:$0xff] %v6053_v13  ;;  %v6055_v28 = vand.u32 4294901760, %v2622_v56 }
  0xbf   : > { %4690 = vmatmul.mubr.f32.gmra.mxu0 %v5823_v31  ;;  %4721 = vmatmul.mubr.f32.gmra.mxu1 %v1713_v12  ;;  %7197 = vst [vmem:[#allocation25_spill] sm:$0xff] %v6055_v28 }
  0xc0   : > { %4692 = vmatprep.mubr.f32.mxu0 %v5833_v34  ;;  %4755 = vmatprep.mubr.f32.mxu1 %v5651_v33 }
  0xc3   : > { %4693 = vmatmul.mubr.f32.gmra.mxu0 %v5841_v52  ;;  %4756 = vmatmul.mubr.f32.vlgmr.msra.gmra.mxu1 %v5659_v35  ;;  %v6037_v52 = vsub.f32 %v2624_v25, %v6019_v61  ;;  %v6096_v25 = vand.u32 4294901760, %v2620_v19 }
  0xc4   : > { %4727 = vmatprep.mubr.f32.mxu0 %v5651_v33  ;;  %4758 = vmatprep.mubr.f32.mxu1 %v5666_v42 }
  0xc5   : > { %7192 = vst [vmem:[#allocation20_spill] sm:$0xff] %v6037_v52  ;;  %v6050_v15 = vand.u32 4294901760, %v6037_v52  ;;  %7203 = vst [vmem:[#allocation31_spill] sm:$0xff] %v6096_v25 }
  0xc7   : > { %4728 = vmatmul.mubr.f32.vlgmr.msra.gmra.mxu0 %v5659_v35  ;;  %4759 = vmatmul.mubr.f32.gmra.mxu1 %v5677_v51  ;;  %v2629_v35 = vld [vmem:[%s7070_s4 + $0x78] sm:$0xff]  ;;  %7195 = vst [vmem:[#allocation23_spill] sm:$0xff] %v6050_v15 }
  0xc8   : > { %4730 = vmatprep.mubr.f32.mxu0 %v5666_v42  ;;  %4761 = vmatprep.mubr.f32.mxu1 %v5687_v17  ;;  %v5944_v50 = vand.u32 4294901760, %v2629_v35 }
  0xca   : > { %7177 = vst [vmem:[#allocation5_spill] sm:$0xff] %v5944_v50  ;;  %4779 = vmatprep.subr.mxu0 %v5944_v50 }
  0xcb   : > { %4731 = vmatmul.mubr.f32.gmra.mxu0 %v5677_v51  ;;  %4762 = vmatmul.mubr.f32.gmra.mxu1 %v5691_v36  ;;  %v2628_v51 = vld [vmem:[%s7070_s4 + $0x70] sm:$0xff] }
  0xcc   : > { %4733 = vmatprep.mubr.f32.mxu0 %v5687_v17  ;;  %4764 = vmatprep.mubr.f32.mxu1 %v5693_v37  ;;  %v5950_v17 = vsub.f32 %v2629_v35, %v5944_v50  ;;  %v6073_v35 = vand.u32 4294901760, %v6053_v13 }
  0xcd   : > { %4780 = vmatpush3.msra.mxu0 %v5944_v50 }
  0xce   : > { %7178 = vst [vmem:[#allocation6_spill] sm:$0xff] %v5950_v17  ;;  %v5966_v6 = vand.u32 4294901760, %v5950_v17  ;;  %7198 = vst [vmem:[#allocation26_spill] sm:$0xff] %v6073_v35 }
  0xcf   : > { %4734 = vmatmul.mubr.f32.gmra.mxu0 %v5691_v36  ;;  %4765 = vmatmul.mubr.f32.gmra.mxu1 %v5719_v14  ;;  %v5952_v36 = vand.u32 4294901760, %v2628_v51 }
  0xd0   : > { %4736 = vmatprep.mubr.f32.mxu0 %v5693_v37  ;;  %4767 = vmatprep.mubr.f32.mxu1 %v5728_v48  ;;  %7180 = vst [vmem:[#allocation8_spill] sm:$0xff] %v5966_v6  ;;  %v2875_v62 = vsub.f32 %v5950_v17, %v5966_v6 }
  0xd1   : > { %7179 = vst [vmem:[#allocation7_spill] sm:$0xff] %v5952_v36  ;;  %v5969_v9 = vsub.f32 %v2628_v51, %v5952_v36  ;;  %4781 = vmatprep.subr.mxu0 %v5952_v36  ;;  %v6076_v51 = vsub.f32 %v2622_v56, %v6055_v28  ;;  %v6115_v56 = vsub.f32 %v2620_v19, %v6096_v25 }
  0xd2   : > { %4782 = vmatpush3.msra.mxu0 %v5952_v36  ;;  %v2876_v44 = vand.u32 4294901760, %v2875_v62  ;;  %v2917_v62 = vsub.f32 %v6053_v13, %v6073_v35  ;;  %v2616_v35 = vld [vmem:[%s7070_s4 + $0x10] sm:$0xff] }
  0xd3   : > { %4737 = vmatmul.mubr.f32.gmra.mxu0 %v5719_v14  ;;  %4768 = vmatmul.mubr.f32.gmra.mxu1 %v5753_v30  ;;  %7181 = vst [vmem:[#allocation9_spill] sm:$0xff] %v5969_v9  ;;  %v2626_v14 = vld [vmem:[%s7070_s4 + $0x60] sm:$0xff]  ;;  %v5981_v20 = vand.u32 4294901760, %v5969_v9  ;;  %7199 = vst [vmem:[#allocation27_spill] sm:$0xff] %v6076_v51 }
  0xd4   : > { %4739 = vmatprep.mubr.f32.mxu0 %v5728_v48  ;;  %4770 = vmatprep.mubr.f32.mxu1 %v5759_v21  ;;  %v5986_v60 = vand.u32 4294901760, %v2626_v14  ;;  %7206 = vst [vmem:[#allocation34_spill] sm:$0xff] %v6115_v56 }
  0xd5   : > { %7183 = vst [vmem:[#allocation11_spill] sm:$0xff] %v5981_v20  ;;  %4783 = vmatprep.subr.mxu0 %v5971_v46  ;;  %v2882_v49 = vsub.f32 %v5969_v9, %v5981_v20  ;;  %4835 = vmatprep.subr.mxu1 %v2876_v44 }
  0xd6   : > { %7185 = vst [vmem:[#allocation13_spill] sm:$0xff] %v5986_v60  ;;  %4784 = vmatpush3.msra.mxu0 %v5971_v46  ;;  %v6005_v53 = vsub.f32 %v2626_v14, %v5986_v60  ;;  %4836 = vmatpush3.msra.mxu1 %v2876_v44 }
  0xd7   : > { %4740 = vmatmul.mubr.f32.gmra.mxu0 %v5753_v30  ;;  %4771 = vmatmul.mubr.f32.gmra.mxu1 %v5780_v45  ;;  %v2625_v30 = vld [vmem:[%s7070_s4 + $0x58] sm:$0xff]  ;;  %v2883_v7 = vand.u32 4294901760, %v2882_v49 }
  0xd8   : > { %4742 = vmatprep.mubr.f32.mxu0 %v5759_v21  ;;  %4773 = vmatprep.mubr.f32.mxu1 %v5786_v18  ;;  %7187 = vst [vmem:[#allocation15_spill] sm:$0xff] %v6005_v53 }
  0xd9   : > { %4785 = vmatprep.subr.mxu0 %v5986_v60  ;;  %4837 = vmatprep.subr.mxu1 %v2883_v7 }
  0xda   : > { %4786 = vmatpush3.msra.mxu0 %v5986_v60  ;;  %4838 = vmatpush3.msra.mxu1 %v2883_v7 }
  0xdb   : > { %4743 = vmatmul.mubr.f32.gmra.mxu0 %v5780_v45  ;;  %4774 = vmatmul.mubr.f32.gmra.mxu1 %v5806_v59  ;;  %v6002_v45 = vand.u32 4294901760, %v5984_v24 }
  0xdc   : > { %4745 = vmatprep.mubr.f32.mxu0 %v5786_v18  ;;  %4776 = vmatprep.mubr.f32.mxu1 %v5813_v11  ;;  %v6008_v18 = vand.u32 4294901760, %v2625_v30 }
  0xdd   : > { %7186 = vst [vmem:[#allocation14_spill] sm:$0xff] %v6002_v45  ;;  %v2889_v1 = vsub.f32 %v5984_v24, %v6002_v45 }
  0xde   : > { %7188 = vst [vmem:[#allocation16_spill] sm:$0xff] %v6008_v18  ;;  %4787 = vmatprep.subr.mxu0 %v6008_v18 }
  0xdf   : > { %4746 = vmatmul.mubr.f32.gmra.mxu0 %v5806_v59  ;;  %4777 = vmatmul.mubr.f32.gmra.mxu1 %v5825_v10  ;;  %v2890_v40 = vand.u32 4294901760, %v2889_v1  ;;  %v2918_v1 = vand.u32 4294901760, %v2917_v62 }
  0xe0   : > { %4748 = vmatprep.mubr.f32.mxu0 %v5813_v11  ;;  %v6017_v11 = vand.u32 4294901760, %v6005_v53  ;;  %4788 = vmatpush3.msra.mxu0 %v6008_v18 }
  0xe1   : > { %4789 = vmatprep.subr.mxu0 %v6019_v61  ;;  %4839 = vmatprep.subr.mxu1 %v2890_v40 }
  0xe2   : > { %7189 = vst [vmem:[#allocation17_spill] sm:$0xff] %v6017_v11  ;;  %v2896_v43 = vsub.f32 %v6005_v53, %v6017_v11  ;;  %4790 = vmatpush3.msra.mxu0 %v6019_v61  ;;  %4840 = vmatpush3.msra.mxu1 %v2890_v40  ;;  %v6165_v11 = vand.u32 4294901760, %v2616_v35 }
  0xe3   : > { %4749 = vmatmul.mubr.f32.gmra.mxu0 %v5825_v10  ;;  %v4477_v54 = vpop.f32.mrf.mxu1  ;;  %v6024_v10 = vsub.f32 %v2625_v30, %v6008_v18  ;;  %4791 = vmatprep.subr.mxu0 %v6039_v29  ;;  %v6088_v30 = vand.u32 4294901760, %v6076_v51 }
  0xe4   : > { %v2897_v12 = vand.u32 4294901760, %v2896_v43  ;;  %4792 = vmatpush3.msra.mxu0 %v6039_v29  ;;  %7215 = vst [vmem:[#allocation43_spill] sm:$0xff] %v6165_v11 }
  0xe5   : > { %v5933_v27 = vpop.f32.mrf.mxu1  ;;  %7191 = vst [vmem:[#allocation19_spill] sm:$0xff] %v6024_v10  ;;  %v6043_v5 = vand.u32 4294901760, %v6024_v10  ;;  %4793 = vmatprep.subr.mxu0 %v6055_v28  ;;  %7201 = vst [vmem:[#allocation29_spill] sm:$0xff] %v6088_v30  ;;  %v2924_v32 = vsub.f32 %v6076_v51, %v6088_v30 }
  0xe6   : > { %v4449_v4 = vpop.f32.mrf.mxu0  ;;  %4841 = vmatprep.subr.mxu1 %v2897_v12  ;;  %4794 = vmatpush3.msra.mxu0 %v6055_v28 }
  0xe7   : > { %v4480_v8 = vpop.f32.mrf.mxu1  ;;  %v5935_v33 = vadd.f32 %v4477_v54, %v4449_v4  ;;  %7194 = vst [vmem:[#allocation22_spill] sm:$0xff] %v6043_v5  ;;  %v2903_v22 = vsub.f32 %v6024_v10, %v6043_v5  ;;  %4842 = vmatpush3.msra.mxu1 %v2897_v12 }
  0xe8   : > { %v5940_v41 = vpop.f32.mrf.mxu0 }
  0xe9   : > { %v5942_v42 = vpop.f32.mrf.mxu1 }
  0xeb   : > { %v4452_v63 = vpop.f32.mrf.mxu0  ;;  %v4483_v0 = vpop.f32.mrf.mxu1 }
  0xec   : > { %v5955_v37 = vadd.f32 %v4480_v8, %v4452_v63  ;;  %v2910_v8 = vsub.f32 %v6037_v52, %v6050_v15  ;;  %v6078_v63 = vand.u32 4294901760, %v2621_v23 }
  0xed   : > { %v5961_v47 = vpop.f32.mrf.mxu0  ;;  %v5963_v57 = vpop.f32.mrf.mxu1 }
  0xee   : > { %7200 = vst [vmem:[#allocation28_spill] sm:$0xff] %v6078_v63  ;;  %v6091_v44 = vsub.f32 %v2621_v23, %v6078_v63  ;;  %4795 = vmatprep.subr.mxu0 %v6078_v63 }
  0xef   : > { %v4455_v26 = vpop.f32.mrf.mxu0  ;;  %v4486_v48 = vpop.f32.mrf.mxu1  ;;  %4796 = vmatpush3.msra.mxu0 %v6078_v63 }
  0xf0   : > { %v5989_v3 = vadd.f32 %v4483_v0, %v4455_v26  ;;  %v2904_v0 = vand.u32 4294901760, %v2903_v22  ;;  %7202 = vst [vmem:[#allocation30_spill] sm:$0xff] %v6091_v44  ;;  %v6109_v40 = vand.u32 4294901760, %v6091_v44  ;;  %4797 = vmatprep.subr.mxu0 %v6096_v25  ;;  %v2925_v22 = vand.u32 4294901760, %v2924_v32 }
  0xf1   : > { %v5995_v21 = vpop.f32.mrf.mxu0  ;;  %v5997_v39 = vpop.f32.mrf.mxu1  ;;  %4798 = vmatpush3.msra.mxu0 %v6096_v25 }
  0xf2   : > { %4843 = vmatprep.subr.mxu1 %v2904_v0  ;;  %7204 = vst [vmem:[#allocation32_spill] sm:$0xff] %v6109_v40  ;;  %v2931_v23 = vsub.f32 %v6091_v44, %v6109_v40 }
  0xf3   : > { %v4458_v55 = vpop.f32.mrf.mxu0  ;;  %v4489_v59 = vpop.f32.mrf.mxu1  ;;  %4844 = vmatpush3.msra.mxu1 %v2904_v0 }
  0xf4   : > { %v6021_v31 = vadd.f32 %v4486_v48, %v4458_v55  ;;  %v2911_v48 = vand.u32 4294901760, %v2910_v8  ;;  %v2619_v55 = vld [vmem:[%s7070_s4 + $0x28] sm:$0xff]  ;;  %v2932_v32 = vand.u32 4294901760, %v2931_v23 }
  0xf5   : > { %v6030_v34 = vpop.f32.mrf.mxu0  ;;  %v6032_v38 = vpop.f32.mrf.mxu1  ;;  %v6111_v43 = vand.u32 4294901760, %v2619_v55 }
  0xf6   : > { %4845 = vmatprep.subr.mxu1 %v2911_v48 }
  0xf7   : > { %v4461_v58 = vpop.f32.mrf.mxu0  ;;  %v4492_v2 = vpop.f32.mrf.mxu1  ;;  %7205 = vst [vmem:[#allocation33_spill] sm:$0xff] %v6111_v43  ;;  %4846 = vmatpush3.msra.mxu1 %v2911_v48  ;;  %v6124_v8 = vsub.f32 %v2619_v55, %v6111_v43  ;;  %v2617_v48 = vld [vmem:[%s7070_s4 + $0x18] sm:$0xff]  ;;  %4799 = vmatprep.subr.mxu0 %v6111_v43 }
  0xf8   : > { %v6058_v16 = vadd.f32 %v4489_v59, %v4461_v58  ;;  %v2618_v58 = vld [vmem:[%s7070_s4 + $0x20] sm:$0xff]  ;;  %4847 = vmatprep.subr.mxu1 %v2918_v1  ;;  %4800 = vmatpush3.msra.mxu0 %v6111_v43 }
  0xf9   : > { %v6066_v54 = vpop.f32.mrf.mxu0  ;;  %v6068_v4 = vpop.f32.mrf.mxu1  ;;  %7207 = vst [vmem:[#allocation35_spill] sm:$0xff] %v6124_v8  ;;  %v6126_v0 = vand.u32 4294901760, %v2618_v58  ;;  %4848 = vmatpush3.msra.mxu1 %v2918_v1  ;;  %v6143_v40 = vand.u32 4294901760, %v6124_v8 }
  0xfa   : > { %4849 = vmatprep.subr.mxu1 %v2925_v22 }
  0xfb   : > { %v4464_v14 = vpop.f32.mrf.mxu0  ;;  %v4495_v26 = vpop.f32.mrf.mxu1  ;;  %7208 = vst [vmem:[#allocation36_spill] sm:$0xff] %v6126_v0  ;;  %7210 = vst [vmem:[#allocation38_spill] sm:$0xff] %v6143_v40  ;;  %4801 = vmatprep.subr.mxu0 %v6126_v0  ;;  %4850 = vmatpush3.msra.mxu1 %v2925_v22 }
  0xfc   : > { %v6094_v49 = vadd.f32 %v4492_v2, %v4464_v14  ;;  %v6132_v14 = vand.u32 4294901760, %v6115_v56  ;;  %4802 = vmatpush3.msra.mxu0 %v6126_v0  ;;  %4851 = vmatprep.subr.mxu1 %v2932_v32 }
  0xfd   : > { %v6102_v59 = vpop.f32.mrf.mxu0  ;;  %v6104_v7 = vpop.f32.mrf.mxu1  ;;  %4852 = vmatpush3.msra.mxu1 %v2932_v32 }
  0xfe   : > { %7209 = vst [vmem:[#allocation37_spill] sm:$0xff] %v6132_v14  ;;  %v2938_v30 = vsub.f32 %v6115_v56, %v6132_v14 }
  0xff   : > { %v4467_v2 = vpop.f32.mrf.mxu0  ;;  %v4498_v12 = vpop.f32.mrf.mxu1 }
 0x100   : > { %v6129_v19 = vadd.f32 %v4495_v26, %v4467_v2  ;;  %v6146_v26 = vsub.f32 %v2618_v58, %v6126_v0  ;;  %v6148_v2 = vand.u32 4294901760, %v2617_v48  ;;  %v2945_v58 = vsub.f32 %v6124_v8, %v6143_v40 }
 0x101   : > { %v6138_v62 = vpop.f32.mrf.mxu0  ;;  %v6140_v55 = vpop.f32.mrf.mxu1  ;;  %v2939_v45 = vand.u32 4294901760, %v2938_v30  ;;  %v6181_v8 = vsub.f32 %v2616_v35, %v6165_v11  ;;  %v2615_v30 = vld [vmem:[%s7070_s4 + $0x8] sm:$0xff] }
 0x102   : > { %7211 = vst [vmem:[#allocation39_spill] sm:$0xff] %v6146_v26  ;;  %7212 = vst [vmem:[#allocation40_spill] sm:$0xff] %v6148_v2  ;;  %v6160_v15 = vand.u32 4294901760, %v6146_v26  ;;  %v6163_v5 = vsub.f32 %v2617_v48, %v6148_v2  ;;  %4803 = vmatprep.subr.mxu0 %v6148_v2  ;;  %v2946_v40 = vand.u32 4294901760, %v2945_v58 }
 0x103   : > { %v4470_v1 = vpop.f32.mrf.mxu0  ;;  %v4533_v23 = vpop.f32.mrf.mxu1  ;;  %7217 = vst [vmem:[#allocation45_spill] sm:$0xff] %v6181_v8  ;;  %4804 = vmatpush3.msra.mxu0 %v6148_v2  ;;  %4853 = vmatprep.subr.mxu1 %v2939_v45  ;;  %v6193_v35 = vand.u32 4294901760, %v6181_v8 }
 0x104   : > { %7213 = vst [vmem:[#allocation41_spill] sm:$0xff] %v6160_v15  ;;  %7214 = vst [vmem:[#allocation42_spill] sm:$0xff] %v6163_v5  ;;  %v6168_v14 = vadd.f32 %v4498_v12, %v4470_v1  ;;  %v2952_v48 = vsub.f32 %v6146_v26, %v6160_v15  ;;  %v6178_v6 = vand.u32 4294901760, %v6163_v5  ;;  %v6187_v12 = vand.u32 4294901760, %v2615_v30  ;;  %4805 = vmatprep.subr.mxu0 %v6165_v11  ;;  %v2614_v26 = vld [vmem:[%s7070_s4] sm:$0xff] }
 0x105   : > { %v6171_v22 = vpop.f32.mrf.mxu0  ;;  %v6173_v20 = vpop.f32.mrf.mxu1  ;;  %4854 = vmatpush3.msra.mxu1 %v2939_v45  ;;  %7219 = vst [vmem:[#allocation47_spill] sm:$0xff] %v6193_v35  ;;  %4806 = vmatpush3.msra.mxu0 %v6165_v11  ;;  %v6203_v45 = vand.u32 4294901760, %v2614_v26  ;;  %v2966_v44 = vsub.f32 %v6181_v8, %v6193_v35 }
 0x106   : > { %7216 = vst [vmem:[#allocation44_spill] sm:$0xff] %v6178_v6  ;;  %7218 = vst [vmem:[#allocation46_spill] sm:$0xff] %v6187_v12  ;;  %v2953_v58 = vand.u32 4294901760, %v2952_v48  ;;  %v2959_v15 = vsub.f32 %v6163_v5, %v6178_v6  ;;  %4855 = vmatprep.subr.mxu1 %v2946_v40  ;;  %v6201_v2 = vsub.f32 %v2615_v30, %v6187_v12  ;;  %4807 = vmatprep.subr.mxu0 %v6187_v12 }
 0x107   : > { %v4505_v32 = vpop.f32.mrf.mxu0  ;;  %v4536_v1 = vpop.f32.mrf.mxu1  ;;  %7221 = vst [vmem:[#allocation49_spill] sm:$0xff] %v6203_v45  ;;  %4856 = vmatpush3.msra.mxu1 %v2946_v40  ;;  %4808 = vmatpush3.msra.mxu0 %v6187_v12 }
 0x108   : > { %v813_v56 = vadd.f32 %v4505_v32, %v5935_v33  ;;  %7220 = vst [vmem:[#allocation48_spill] sm:$0xff] %v6201_v2  ;;  %v2960_v5 = vand.u32 4294901760, %v2959_v15  ;;  %4857 = vmatprep.subr.mxu1 %v2953_v58  ;;  %v6216_v30 = vand.u32 4294901760, %v6201_v2  ;;  %v6219_v32 = vsub.f32 %v2614_v26, %v6203_v45  ;;  %4809 = vmatprep.subr.mxu0 %v6203_v45 }
 0x109   : > { %v6206_v48 = vpop.f32.mrf.mxu0  ;;  %v6208_v6 = vpop.f32.mrf.mxu1  ;;  %4858 = vmatpush3.msra.mxu1 %v2953_v58  ;;  %v2967_v15 = vand.u32 4294901760, %v2966_v44  ;;  %4810 = vmatpush3.msra.mxu0 %v6203_v45 }
 0x10a   : > { %v6213_v33 = vadd.f32 %v4533_v23, %v813_v56  ;;  %7222 = vst [vmem:[#allocation50_spill] sm:$0xff] %v6216_v30  ;;  %7223 = vst [vmem:[#allocation51_spill] sm:$0xff] %v6219_v32  ;;  %4859 = vmatprep.subr.mxu1 %v2960_v5  ;;  %v2973_v56 = vsub.f32 %v6201_v2, %v6216_v30  ;;  %v6227_v23 = vand.u32 4294901760, %v6219_v32  ;;  %4891 = vmatprep.subr.mxu0 %v5950_v17 }
 0x10b   : > { %v4508_v11 = vpop.f32.mrf.mxu0  ;;  %v4539_v0 = vpop.f32.mrf.mxu1  ;;  %4860 = vmatpush3.msra.mxu1 %v2960_v5 }
 0x10c   : > { %v827_v40 = vadd.f32 %v4508_v11, %v5955_v37  ;;  %7224 = vst [vmem:[#allocation52_spill] sm:$0xff] %v6227_v23  ;;  %4861 = vmatprep.subr.mxu1 %v2967_v15  ;;  %v2974_v44 = vand.u32 4294901760, %v2973_v56  ;;  %v2980_v37 = vsub.f32 %v6219_v32, %v6227_v23 }
 0x10d   : > { %v819_v26 = vpop.f32.mrf.mxu0  ;;  %v6230_v35 = vpop.f32.mrf.mxu1  ;;  %4862 = vmatpush3.msra.mxu1 %v2967_v15 }
 0x10e   : > { %v6232_v8 = vadd.f32 %v4536_v1, %v827_v40  ;;  %4863 = vmatprep.subr.mxu1 %v2974_v44  ;;  %v2981_v2 = vand.u32 4294901760, %v2980_v37 }
 0x10f   : > { %v4511_v11 = vpop.f32.mrf.mxu0  ;;  %v4542_v58 = vpop.f32.mrf.mxu1  ;;  %4864 = vmatpush3.msra.mxu1 %v2974_v44 }
 0x110   : > { %v841_v30 = vadd.f32 %v4511_v11, %v5989_v3  ;;  %4865 = vmatprep.subr.mxu1 %v2981_v2 }
 0x111   : > { %v833_v45 = vpop.f32.mrf.mxu0  ;;  %v6237_v12 = vpop.f32.mrf.mxu1  ;;  %4866 = vmatpush3.msra.mxu1 %v2981_v2 }
 0x112   : > { %v6239_v51 = vadd.f32 %v4539_v0, %v841_v30  ;;  %4947 = vmatprep.subr.mxu1 %v5944_v50 }
 0x113   : > { %v4514_v5 = vpop.f32.mrf.mxu0  ;;  %v4545_v1 = vpop.f32.mrf.mxu1 }
 0x114   : > { %v855_v40 = vadd.f32 %v4514_v5, %v6021_v31 }
 0x115   : > { %v847_v56 = vpop.f32.mrf.mxu0  ;;  %v6243_v15 = vpop.f32.mrf.mxu1 }
 0x116   : > { %v6245_v3 = vadd.f32 %v4542_v58, %v855_v40 }
 0x117   : > { %v4517_v37 = vpop.f32.mrf.mxu0  ;;  %v4548_v11 = vpop.f32.mrf.mxu1 }
 0x118   : > { %v869_v23 = vadd.f32 %v4517_v37, %v6058_v16 }
 0x119   : > { %v861_v44 = vpop.f32.mrf.mxu0  ;;  %v6248_v0 = vpop.f32.mrf.mxu1 }
 0x11a   : > { %v6250_v30 = vadd.f32 %v4545_v1, %v869_v23  ;;  %v640_v23 = vadd.f32 %v5933_v27, %v5940_v41 }
 0x11b   : > { %v4520_v32 = vpop.f32.mrf.mxu0  ;;  %v4551_v2 = vpop.f32.mrf.mxu1 }
 0x11c   : > { %v883_v31 = vadd.f32 %v4520_v32, %v6094_v49  ;;  %v806_v52 = vadd.f32 %v6206_v48, %v640_v23 }
 0x11d   : > { %v6253_v5 = vpop.f32.mrf.mxu0  ;;  %v6255_v43 = vpop.f32.mrf.mxu1 }
 0x11e   : > { %v6257_v13 = vadd.f32 %v4548_v11, %v883_v31  ;;  %v986_v27 = vadd.f32 %v6173_v20, %v806_v52 }
 0x11f   : > { %v4523_v58 = vpop.f32.mrf.mxu0  ;;  %v4554_v40 = vpop.f32.mrf.mxu1 }
 0x120   : > { %v897_v25 = vadd.f32 %v4523_v58, %v6129_v19  ;;  %v652_v19 = vadd.f32 %v5942_v42, %v5961_v47 }
 0x121   : > { %v6260_v16 = vpop.f32.mrf.mxu0  ;;  %v6262_v37 = vpop.f32.mrf.mxu1 }
 0x122   : > { %v6266_v1 = vadd.f32 %v4551_v2, %v897_v25  ;;  %v820_v41 = vadd.f32 %v819_v26, %v652_v19 }
 0x123   : > { %v4526_v49 = vpop.f32.mrf.mxu0  ;;  %v4589_v32 = vpop.f32.mrf.mxu1 }
 0x124   : > { %v911_v11 = vadd.f32 %v4526_v49, %v6168_v14  ;;  %v664_v14 = vadd.f32 %v5963_v57, %v5995_v21  ;;  %v1002_v42 = vadd.f32 %v6208_v6, %v820_v41 }
 0x125   : > { %v6270_v31 = vpop.f32.mrf.mxu0  ;;  %v1345_v63 = vpop.f32.mrf.mxu1 }
 0x126   : > { %v6274_v58 = vadd.f32 %v4554_v40, %v911_v11  ;;  %v834_v47 = vadd.f32 %v833_v45, %v664_v14 }
 0x127   : > { %v4561_v10 = vpop.f32.mrf.mxu0  ;;  %v4592_v28 = vpop.f32.mrf.mxu1 }
 0x128   : > { %v1189_v25 = vadd.f32 %v4561_v10, %v6213_v33  ;;  %v676_v10 = vadd.f32 %v5997_v39, %v6030_v34  ;;  %v1018_v11 = vadd.f32 %v6230_v35, %v834_v47 }
 0x129   : > { %v1182_v2 = vpop.f32.mrf.mxu0  ;;  %v1357_v53 = vpop.f32.mrf.mxu1 }
 0x12a   : > { %v6280_v48 = vadd.f32 %v4589_v32, %v1189_v25  ;;  %v1183_v23 = vadd.f32 %v1182_v2, %v986_v27  ;;  %v848_v19 = vadd.f32 %v847_v56, %v676_v10 }
 0x12b   : > { %v4564_v49 = vpop.f32.mrf.mxu0  ;;  %v4595_v29 = vpop.f32.mrf.mxu1 }
 0x12c   : > { %v6283_v40 = vadd.f32 %v1345_v63, %v1183_v23  ;;  %v1201_v20 = vadd.f32 %v4564_v49, %v6232_v8  ;;  %v688_v8 = vadd.f32 %v6032_v38, %v6066_v54  ;;  %v1034_v25 = vadd.f32 %v6237_v12, %v848_v19 }
 0x12d   : > { %v1194_v52 = vpop.f32.mrf.mxu0  ;;  %v1369_v26 = vpop.f32.mrf.mxu1 }
 0x12e   : > { %v6288_v33 = vadd.f32 %v4592_v28, %v1201_v20  ;;  %v1195_v57 = vadd.f32 %v1194_v52, %v1002_v42  ;;  %v862_v2 = vadd.f32 %v861_v44, %v688_v8  ;;  %v712_v20 = vadd.f32 %v6104_v7, %v6138_v62 }
 0x12f   : > { %v4567_v21 = vpop.f32.mrf.mxu0  ;;  %v4598_v32 = vpop.f32.mrf.mxu1 }
 0x130   : > { %v6291_v27 = vadd.f32 %v1357_v53, %v1195_v57  ;;  %v1213_v6 = vadd.f32 %v4567_v21, %v6239_v51  ;;  %v700_v51 = vadd.f32 %v6068_v4, %v6102_v59  ;;  %v1050_v49 = vadd.f32 %v6243_v15, %v862_v2 }
 0x131   : > { %v1206_v63 = vpop.f32.mrf.mxu0  ;;  %v1381_v45 = vpop.f32.mrf.mxu1  ;;  %v890_v15 = vadd.f32 %v6260_v16, %v712_v20 }
 0x132   : > { %v6296_v41 = vadd.f32 %v4595_v29, %v1213_v6  ;;  %v1207_v39 = vadd.f32 %v1206_v63, %v1018_v11  ;;  %v876_v42 = vadd.f32 %v6253_v5, %v700_v51 }
 0x133   : > { %v4570_v34 = vpop.f32.mrf.mxu0  ;;  %v4601_v28 = vpop.f32.mrf.mxu1  ;;  %v1082_v6 = vadd.f32 %v6255_v43, %v890_v15 }
 0x134   : > { %7225 = vst [vmem:[#allocation53_spill] sm:$0xff] %v6296_v41  ;;  %v6299_v14 = vadd.f32 %v1369_v26, %v1207_v39  ;;  %v1225_v53 = vadd.f32 %v4570_v34, %v6245_v3  ;;  %v1066_v10 = vadd.f32 %v6248_v0, %v876_v42 }
 0x135   : > { %v1218_v35 = vpop.f32.mrf.mxu0  ;;  %v1393_v56 = vpop.f32.mrf.mxu1 }
 0x136   : > { %7226 = vst [vmem:[#allocation54_spill] sm:$0xff] %v6299_v14  ;;  %v6304_v23 = vadd.f32 %v4598_v32, %v1225_v53  ;;  %v1219_v38 = vadd.f32 %v1218_v35, %v1034_v25  ;;  %v724_v32 = vadd.f32 %v6140_v55, %v6171_v22 }
 0x137   : > { %v4573_v29 = vpop.f32.mrf.mxu0  ;;  %v4604_v54 = vpop.f32.mrf.mxu1 }
 0x138   : > { %7227 = vst [vmem:[#allocation55_spill] sm:$0xff] %v6304_v23  ;;  %v6308_v12 = vadd.f32 %v1381_v45, %v1219_v38  ;;  %v1237_v44 = vadd.f32 %v4573_v29, %v6250_v30  ;;  %v904_v0 = vadd.f32 %v6270_v31, %v724_v32 }
 0x139   : > { %v1230_v47 = vpop.f32.mrf.mxu0  ;;  %v1405_v3 = vpop.f32.mrf.mxu1 }
 0x13a   : > { %7228 = vst [vmem:[#allocation56_spill] sm:$0xff] %v6308_v12  ;;  %v6313_v52 = vadd.f32 %v4601_v28, %v1237_v44  ;;  %v1231_v4 = vadd.f32 %v1230_v47, %v1050_v49  ;;  %v1098_v22 = vadd.f32 %v6262_v37, %v904_v0 }
 0x13b   : > { %v4576_v59 = vpop.f32.mrf.mxu0  ;;  %v4607_v26 = vpop.f32.mrf.mxu1 }
 0x13c   : > { %7229 = vst [vmem:[#allocation57_spill] sm:$0xff] %v6313_v52  ;;  %v6317_v57 = vadd.f32 %v1393_v56, %v1231_v4  ;;  %v1249_v5 = vadd.f32 %v4576_v59, %v6257_v13 }
 0x13d   : > { %v1242_v21 = vpop.f32.mrf.mxu0  ;;  %v1417_v30 = vpop.f32.mrf.mxu1 }
 0x13e   : > { %7230 = vst [vmem:[#allocation58_spill] sm:$0xff] %v6317_v57  ;;  %v6322_v11 = vadd.f32 %v4604_v54, %v1249_v5  ;;  %v1243_v7 = vadd.f32 %v1242_v21, %v1066_v10 }
 0x13f   : > { %v4579_v62 = vpop.f32.mrf.mxu0  ;;  %v4610_v19 = vpop.f32.mrf.mxu1 }
 0x140   : > { %7231 = vst [vmem:[#allocation59_spill] sm:$0xff] %v6322_v11  ;;  %v6326_v63 = vadd.f32 %v1405_v3, %v1243_v7  ;;  %v1261_v16 = vadd.f32 %v4579_v62, %v6266_v1 }
 0x141   : > { %v1254_v45 = vpop.f32.mrf.mxu0  ;;  %v1429_v13 = vpop.f32.mrf.mxu1 }
 0x142   : > { %7232 = vst [vmem:[#allocation60_spill] sm:$0xff] %v6326_v63  ;;  %v6329_v8 = vadd.f32 %v4607_v26, %v1261_v16  ;;  %v1255_v39 = vadd.f32 %v1254_v45, %v1082_v6 }
 0x143   : > { %v4582_v34 = vpop.f32.mrf.mxu0  ;;  %v6331_v55 = vpop.f32.mrf.mxu1 }
 0x144   : > { %7233 = vst [vmem:[#allocation61_spill] sm:$0xff] %v6329_v8  ;;  %v6334_v28 = vadd.f32 %v1417_v30, %v1255_v39  ;;  %v1273_v43 = vadd.f32 %v4582_v34, %v6274_v58 }
 0x145   : > { %v1266_v25 = vpop.f32.mrf.mxu0  ;;  %v6337_v31 = vpop.f32.mrf.mxu1 }
 0x146   : > { %7234 = vst [vmem:[#allocation62_spill] sm:$0xff] %v6334_v28  ;;  %v6339_v2 = vadd.f32 %v4610_v19, %v1273_v43  ;;  %v1267_v1 = vadd.f32 %v1266_v25, %v1098_v22 }
 0x147   : > { %v6341_v53 = vpop.f32.mrf.mxu0  ;;  %v6343_v35 = vpop.f32.mrf.mxu1 }
 0x148   : > { %7235 = vst [vmem:[#allocation63_spill] sm:$0xff] %v6339_v2  ;;  %v6345_v56 = vadd.f32 %v1429_v13, %v1267_v1  ;;  %v1805_v60 = vadd.f32 %v6331_v55, %v6341_v53 }
 0x149   : > { %v6347_v51 = vpop.f32.mrf.mxu0  ;;  %v6349_v38 = vpop.f32.mrf.mxu1 }
 0x14a   : > { %7236 = vst [vmem:[#allocation64_spill] sm:$0xff] %v6345_v56  ;;  %v1799_v14 = vadd.f32 %v6337_v31, %v6347_v51 }
 0x14b   : > { %v6351_v37 = vpop.f32.mrf.mxu0  ;;  %v6353_v29 = vpop.f32.mrf.mxu1 }
 0x14d   : > { %v6355_v58 = vpop.f32.mrf.mxu0  ;;  %v6357_v54 = vpop.f32.mrf.mxu1 }
 0x14f   : > { %v6359_v49 = vpop.f32.mrf.mxu0  ;;  %v6361_v42 = vpop.f32.mrf.mxu1 }
 0x150   : > { %v1829_v55 = vadd.f32 %v6353_v29, %v6359_v49 }
 0x151   : > { %v6363_v44 = vpop.f32.mrf.mxu0  ;;  %v6365_v47 = vpop.f32.mrf.mxu1 }
 0x152   : > { %v1823_v31 = vadd.f32 %v6357_v54, %v6363_v44 }
 0x153   : > { %v6367_v3 = vpop.f32.mrf.mxu0  ;;  %v4657_v20 = vpop.f32.mrf.mxu1 }
 0x155   : > { %v6369_v4 = vpop.f32.mrf.mxu0  ;;  %v6371_v59 = vpop.f32.mrf.mxu1 }
 0x156   : > { %v1835_v29 = vadd.f32 %v6365_v47, %v6369_v4 }
 0x157   : > { %v4629_v26 = vpop.f32.mrf.mxu0  ;;  %v4660_v10 = vpop.f32.mrf.mxu1 }
 0x158   : > { %v6373_v15 = vadd.f32 %v4657_v20, %v4629_v26 }
 0x159   : > { %v6375_v5 = vpop.f32.mrf.mxu0  ;;  %v6377_v21 = vpop.f32.mrf.mxu1 }
 0x15a   : > { %v1847_v49 = vadd.f32 %v6371_v59, %v6375_v5 }
 0x15b   : > { %v4632_v30 = vpop.f32.mrf.mxu0  ;;  %v4663_v32 = vpop.f32.mrf.mxu1 }
 0x15c   : > { %v6379_v7 = vadd.f32 %v4660_v10, %v4632_v30 }
 0x15d   : > { %v6381_v62 = vpop.f32.mrf.mxu0  ;;  %v1870_v19 = vpop.f32.mrf.mxu1 }
 0x15f   : > { %v4635_v6 = vpop.f32.mrf.mxu0  ;;  %v4666_v0 = vpop.f32.mrf.mxu1 }
 0x160   : > { %v6383_v16 = vadd.f32 %v4663_v32, %v4635_v6 }
 0x161   : > { %v1687_v45 = vpop.f32.mrf.mxu0  ;;  %v1882_v13 = vpop.f32.mrf.mxu1 }
 0x162   : > { %v6385_v39 = vadd.f32 %v1870_v19, %v1687_v45 }
 0x163   : > { %v4638_v34 = vpop.f32.mrf.mxu0  ;;  %v4701_v22 = vpop.f32.mrf.mxu1 }
 0x164   : > { %v6387_v43 = vadd.f32 %v4666_v0, %v4638_v34 }
 0x165   : > { %v1707_v25 = vpop.f32.mrf.mxu0  ;;  %v2144_v1 = vpop.f32.mrf.mxu1 }
 0x166   : > { %7237 = vst [vmem:[#allocation65_spill] sm:$0xff] %v6387_v43  ;;  %v6389_v20 = vadd.f32 %v1882_v13, %v1707_v25  ;;  %v1817_v43 = vadd.f32 %v6343_v35, %v6351_v37 }
 0x167   : > { %v4673_v26 = vpop.f32.mrf.mxu0  ;;  %v4704_v10 = vpop.f32.mrf.mxu1 }
 0x168   : > { %7238 = vst [vmem:[#allocation66_spill] sm:$0xff] %v6389_v20  ;;  %v1972_v36 = vadd.f32 %v4673_v26, %v1805_v60  ;;  %v1841_v26 = vadd.f32 %v6361_v42, %v6367_v3 }
 0x169   : > { %v1964_v30 = vpop.f32.mrf.mxu0  ;;  %v2160_v56 = vpop.f32.mrf.mxu1 }
 0x16a   : > { %v2153_v60 = vadd.f32 %v4701_v22, %v1972_v36 }
 0x16b   : > { %v4676_v2 = vpop.f32.mrf.mxu0  ;;  %v4707_v28 = vpop.f32.mrf.mxu1 }
 0x16c   : > { %v1986_v51 = vadd.f32 %v4676_v2, %v1817_v43  ;;  %v1859_v2 = vadd.f32 %v6377_v21, %v6381_v62 }
 0x16d   : > { %v1978_v32 = vpop.f32.mrf.mxu0  ;;  %v2176_v6 = vpop.f32.mrf.mxu1 }
 0x16e   : > { %v2169_v42 = vadd.f32 %v4704_v10, %v1986_v51 }
 0x16f   : > { %v4679_v8 = vpop.f32.mrf.mxu0  ;;  %v4710_v63 = vpop.f32.mrf.mxu1 }
 0x170   : > { %v2000_v35 = vadd.f32 %v4679_v8, %v1829_v55 }
 0x171   : > { %v1992_v19 = vpop.f32.mrf.mxu0  ;;  %v6391_v45 = vpop.f32.mrf.mxu1 }
 0x172   : > { %v2185_v3 = vadd.f32 %v4707_v28, %v2000_v35 }
 0x173   : > { %v4682_v24 = vpop.f32.mrf.mxu0  ;;  %v6393_v0 = vpop.f32.mrf.mxu1 }
 0x175   : > { %v2006_v34 = vpop.f32.mrf.mxu0  ;;  %v6395_v11 = vpop.f32.mrf.mxu1 }
 0x177   : > { %v4685_v13 = vpop.f32.mrf.mxu0  ;;  %v6397_v25 = vpop.f32.mrf.mxu1 }
 0x178   : > { %v2028_v22 = vadd.f32 %v4685_v13, %v6373_v15 }
 0x179   : > { %v2020_v61 = vpop.f32.mrf.mxu0  ;;  %v6399_v9 = vpop.f32.mrf.mxu1 }
 0x17b   : > { %v4688_v57 = vpop.f32.mrf.mxu0  ;;  %v6401_v18 = vpop.f32.mrf.mxu1 }
 0x17d   : > { %v2034_v17 = vpop.f32.mrf.mxu0  ;;  %v6403_v52 = vpop.f32.mrf.mxu1 }
 0x17e   : > { %7239 = vst [vmem:[#allocation67_spill] sm:$0xff] %v6403_v52  ;;  %v1965_v52 = vadd.f32 %v1964_v30, %v1799_v14  ;;  %v2035_v21 = vadd.f32 %v2034_v17, %v1859_v2 }
 0x17f   : > { %v4691_v20 = vpop.f32.mrf.mxu0  ;;  %v6405_v12 = vpop.f32.mrf.mxu1 }
 0x180   : > { %7240 = vst [vmem:[#allocation68_spill] sm:$0xff] %v6405_v12  ;;  %v1811_v12 = vadd.f32 %v6349_v38, %v6355_v58  ;;  %v2145_v30 = vadd.f32 %v2144_v1, %v1965_v52  ;;  %v1993_v38 = vadd.f32 %v1992_v19, %v1823_v31  ;;  %v2007_v52 = vadd.f32 %v2006_v34, %v1835_v29 }
 0x181   : > { %v2048_v23 = vpop.f32.mrf.mxu0  ;;  %v6409_v46 = vpop.f32.mrf.mxu1  ;;  %v2042_v19 = vadd.f32 %v4688_v57, %v6379_v7 }
 0x182   : > { %7241 = vst [vmem:[#allocation69_spill] sm:$0xff] %v6409_v46  ;;  %v2177_v47 = vadd.f32 %v2176_v6, %v1993_v38  ;;  %v2193_v15 = vadd.f32 %v6391_v45, %v2007_v52  ;;  %v2217_v6 = vadd.f32 %v6393_v0, %v2028_v22  ;;  %v6454_v0 = vadd.f32 %v6399_v9, %v2035_v21  ;;  %v7250_v52 = vld [vmem:[#allocation54_spill] sm:$0xff] }
 0x183   : > { %v6413_v41 = vpop.f32.mrf.mxu0  ;;  %v4757_v50 = vpop.f32.mrf.mxu1  ;;  %v6451_v45 = vadd.f32 %v6397_v25, %v2042_v19 }
 0x184   : > { %7242 = vst [vmem:[#allocation70_spill] sm:$0xff] %v6413_v41  ;;  %v1979_v41 = vadd.f32 %v1978_v32, %v1811_v12  ;;  %v2021_v32 = vadd.f32 %v2020_v61, %v1847_v49 }
 0x185   : > { %v6421_v53 = vpop.f32.mrf.mxu0  ;;  %v2504_v46 = vpop.f32.mrf.mxu1  ;;  %v7244_v25 = vld [vmem:[#allocation67_spill] sm:$0xff] }
 0x186   : > { %7243 = vst [vmem:[#allocation71_spill] sm:$0xff] %v6421_v53  ;;  %v2014_v53 = vadd.f32 %v4682_v24, %v1841_v26  ;;  %v2161_v44 = vadd.f32 %v2160_v56, %v1979_v41  ;;  %v2209_v34 = vadd.f32 %v6395_v11, %v2021_v32  ;;  %v7245_v26 = vld [vmem:[#allocation65_spill] sm:$0xff] }
 0x187   : > { %v4729_v14 = vpop.f32.mrf.mxu0  ;;  %v4760_v37 = vpop.f32.mrf.mxu1 }
 0x188   : > { %v2348_v58 = vadd.f32 %v4729_v14, %v2153_v60  ;;  %v2201_v5 = vadd.f32 %v4710_v63, %v2014_v53 }
 0x189   : > { %v2341_v54 = vpop.f32.mrf.mxu0  ;;  %v2516_v36 = vpop.f32.mrf.mxu1 }
 0x18a   : > { %v2511_v12 = vadd.f32 %v4757_v50, %v2348_v58  ;;  %v2342_v8 = vadd.f32 %v2341_v54, %v2145_v30  ;;  %v7248_v58 = vld [vmem:[#allocation53_spill] sm:$0xff] }
 0x18b   : > { %v4732_v43 = vpop.f32.mrf.mxu0  ;;  %v4763_v1 = vpop.f32.mrf.mxu1  ;;  %v7246_v35 = vld [vmem:[#allocation70_spill] sm:$0xff] }
 0x18c   : > { %v2599_v4 = vmul.f32 %v2511_v12, %v6280_v48  ;;  %v2505_v59 = vadd.f32 %v2504_v46, %v2342_v8  ;;  %v2360_v24 = vadd.f32 %v4732_v43, %v2169_v42  ;;  %v2056_v46 = vadd.f32 %v4691_v20, %v6383_v16 }
 0x18d   : > { %v2353_v62 = vpop.f32.mrf.mxu0  ;;  %v2528_v50 = vpop.f32.mrf.mxu1  ;;  %v2049_v48 = vadd.f32 %v2048_v23, %v6385_v39  ;;  %v2070_v14 = vadd.f32 %v7246_v35, %v7245_v26 }
 0x18e   : > { %v6436_v10 = vand.u32 4294901760, %v2599_v4  ;;  %v2598_v41 = vmul.f32 %v2505_v59, %v6283_v40  ;;  %v2523_v28 = vadd.f32 %v4760_v37, %v2360_v24  ;;  %v2354_v56 = vadd.f32 %v2353_v62, %v2161_v44  ;;  %v7252_v24 = vld [vmem:[#allocation55_spill] sm:$0xff]  ;;  %v7253_v62 = vld [vmem:[#allocation68_spill] sm:$0xff] }
 0x18f   : > { %v4735_v61 = vpop.f32.mrf.mxu0  ;;  %v4766_v63 = vpop.f32.mrf.mxu1  ;;  %v6465_v11 = vadd.f32 %v6401_v18, %v2056_v46  ;;  %v6468_v9 = vadd.f32 %v7244_v25, %v2049_v48  ;;  %v7247_v18 = vld [vmem:[#allocation5_spill] sm:$0xff] }
 0x190   : > { %v6444_v17 = vsub.f32 %v2599_v4, %v6436_v10  ;;  %v6446_v57 = vand.u32 4294901760, %v2598_v41  ;;  %v2601_v7 = vmul.f32 %v2523_v28, %v6288_v33  ;;  %v2517_v40 = vadd.f32 %v2516_v36, %v2354_v56  ;;  %v7249_v36 = vld [vmem:[#allocation7_spill] sm:$0xff] }
 0x191   : > { %v2372_v16 = vadd.f32 %v4735_v61, %v2185_v3  ;;  %v2365_v23 = vpop.f32.mrf.mxu0  ;;  %v2540_v39 = vpop.f32.mrf.mxu1 }
 0x192   : > { %v2723_v20 = vand.u32 4294901760, %v6444_v17  ;;  %v6458_v13 = vsub.f32 %v2598_v41, %v6446_v57  ;;  %v6460_v55 = vand.u32 4294901760, %v2601_v7  ;;  %v2600_v33 = vmul.f32 %v2517_v40, %v6291_v27  ;;  %4867 = vmatprep.mubr.f32.mxu1 %v6446_v57 }
 0x193   : > { %v2535_v53 = vadd.f32 %v4763_v1, %v2372_v16  ;;  %v2366_v31 = vadd.f32 %v2365_v23, %v2177_v47  ;;  %v4738_v60 = vpop.f32.mrf.mxu0  ;;  %4868 = vmatmul.mubr.f32.vlgmr.msra.gmra.mxu1 %v6436_v10  ;;  %v4769_v51 = vpop.f32.mrf.mxu1  ;;  %v7251_v1 = vld [vmem:[#allocation10_spill] sm:$0xff]  ;;  %v7257_v23 = vld [vmem:[#allocation71_spill] sm:$0xff] }
 0x194   : > { %v6474_v37 = vsub.f32 %v2601_v7, %v6460_v55  ;;  %v6476_v27 = vand.u32 4294901760, %v2600_v33  ;;  %v2384_v30 = vadd.f32 %v4738_v60, %v2201_v5  ;;  %4948 = vmatpush3.msra.mxu1 %v7247_v18  ;;  %v2724_v38 = vsub.f32 %v6444_v17, %v2723_v20  ;;  %v7256_v16 = vld [vmem:[#allocation66_spill] sm:$0xff] }
 0x195   : > { %v2603_v29 = vmul.f32 %v2535_v53, %v7248_v58  ;;  %v2529_v49 = vadd.f32 %v2528_v50, %v2366_v31  ;;  %v2377_v54 = vpop.f32.mrf.mxu0  ;;  %4949 = vmatprep.subr.mxu1 %v7249_v36  ;;  %v2552_v2 = vpop.f32.mrf.mxu1  ;;  %v2713_v42 = vand.u32 4294901760, %v6458_v13  ;;  %v6503_v50 = vadd.f32 %v7253_v62, %v2070_v14  ;;  %v7260_v58 = vld [vmem:[#allocation16_spill] sm:$0xff] }
 0x196   : > { %v6486_v12 = vsub.f32 %v2600_v33, %v6476_v27  ;;  %v2547_v8 = vadd.f32 %v4766_v63, %v2384_v30  ;;  %v2378_v44 = vadd.f32 %v2377_v54, %v2193_v15  ;;  %4870 = vmatprep.mubr.f32.mxu1 %v6476_v27  ;;  %4950 = vmatpush3.msra.mxu1 %v7249_v36  ;;  %v2743_v59 = vand.u32 4294901760, %v6474_v37  ;;  %v7254_v15 = vld [vmem:[#allocation13_spill] sm:$0xff]  ;;  %v7255_v63 = vld [vmem:[#allocation56_spill] sm:$0xff] }
 0x197   : > { %v6490_v3 = vand.u32 4294901760, %v2603_v29  ;;  %v2602_v22 = vmul.f32 %v2529_v49, %v7250_v52  ;;  %v4741_v43 = vpop.f32.mrf.mxu0  ;;  %4871 = vmatmul.mubr.f32.gmra.mxu1 %v6460_v55  ;;  %4951 = vmatprep.subr.mxu1 %v7251_v1  ;;  %v2714_v47 = vsub.f32 %v6458_v13, %v2713_v42  ;;  %v4772_v4 = vpop.f32.mrf.mxu1  ;;  %v2725_v61 = vand.u32 4294901760, %v2724_v38  ;;  %v7259_v38 = vld [vmem:[#allocation6_spill] sm:$0xff] }
 0x198   : > { %v2605_v5 = vmul.f32 %v2547_v8, %v7252_v24  ;;  %v2541_v32 = vadd.f32 %v2540_v39, %v2378_v44  ;;  %v2396_v19 = vadd.f32 %v4741_v43, %v2217_v6  ;;  %4952 = vmatpush3.msra.mxu1 %v7251_v1  ;;  %v2733_v21 = vand.u32 4294901760, %v6486_v12  ;;  %v7261_v44 = vld [vmem:[#allocation58_spill] sm:$0xff] }
 0x199   : > { %v6506_v41 = vsub.f32 %v2603_v29, %v6490_v3  ;;  %v6508_v28 = vand.u32 4294901760, %v2602_v22  ;;  %v2389_v56 = vpop.f32.mrf.mxu0  ;;  %4953 = vmatprep.subr.mxu1 %v7254_v15  ;;  %v2715_v46 = vand.u32 4294901760, %v2714_v47  ;;  %v2564_v48 = vpop.f32.mrf.mxu1  ;;  %v2063_v39 = vadd.f32 %v7257_v23, %v7256_v16  ;;  %v7263_v24 = vld [vmem:[#allocation18_spill] sm:$0xff] }
 0x19a   : > { %v2604_v6 = vmul.f32 %v2541_v32, %v7255_v63  ;;  %v2559_v7 = vadd.f32 %v4769_v51, %v2396_v19  ;;  %v2390_v40 = vadd.f32 %v2389_v56, %v2209_v34  ;;  %4954 = vmatpush3.msra.mxu1 %v7254_v15  ;;  %v6518_v25 = vand.u32 4294901760, %v2605_v5  ;;  %v7258_v51 = vld [vmem:[#allocation57_spill] sm:$0xff] }
 0x19b   : > { %v6516_v33 = vsub.f32 %v2602_v22, %v6508_v28  ;;  %4811 = vmatprep.mubr.f32.mxu0 %v2715_v46  ;;  %4873 = vmatprep.mubr.f32.mxu1 %v6508_v28  ;;  %v4744_v53 = vpop.f32.mrf.mxu0  ;;  %v2734_v31 = vsub.f32 %v6486_v12, %v2733_v21  ;;  %v4775_v60 = vpop.f32.mrf.mxu1  ;;  %v2744_v14 = vsub.f32 %v6474_v37, %v2743_v59  ;;  %v2763_v8 = vand.u32 4294901760, %v6506_v41  ;;  %v7262_v22 = vld [vmem:[#allocation9_spill] sm:$0xff] }
 0x19c   : > { %v6524_v34 = vand.u32 4294901760, %v2604_v6  ;;  %v2607_v26 = vmul.f32 %v2559_v7, %v7258_v51  ;;  %v2553_v35 = vadd.f32 %v2552_v2, %v2390_v40  ;;  %4812 = vmatmul.mubr.f32.vlgmr.msra.gmra.mxu0 %v2725_v61  ;;  %4874 = vmatmul.mubr.f32.gmra.mxu1 %v6490_v3  ;;  %v2408_v30 = vadd.f32 %v4744_v53, %v6451_v45  ;;  %v7264_v61 = vld [vmem:[#allocation59_spill] sm:$0xff]  ;;  %v7267_v51 = vld [vmem:[#allocation69_spill] sm:$0xff] }
 0x19d   : > { %4892 = vmatpush3.msra.mxu0 %v7259_v38  ;;  %4955 = vmatprep.subr.mxu1 %v7260_v58  ;;  %v2401_v29 = vpop.f32.mrf.mxu0  ;;  %v2735_v49 = vand.u32 4294901760, %v2734_v31  ;;  %v2753_v54 = vand.u32 4294901760, %v6516_v33  ;;  %v6544_v43 = vsub.f32 %v2605_v5, %v6518_v25  ;;  %v2576_v19 = vpop.f32.mrf.mxu1  ;;  %v2745_v5 = vand.u32 4294901760, %v2744_v14  ;;  %v7268_v14 = vld [vmem:[#allocation21_spill] sm:$0xff] }
 0x19e   : > { %v6537_v2 = vsub.f32 %v2604_v6, %v6524_v34  ;;  %v2606_v52 = vmul.f32 %v2553_v35, %v7261_v44  ;;  %4893 = vmatprep.subr.mxu0 %v7262_v22  ;;  %4956 = vmatpush3.msra.mxu1 %v7260_v58  ;;  %v2402_v45 = vadd.f32 %v2401_v29, %v6454_v0  ;;  %v7265_v6 = vld [vmem:[#allocation12_spill] sm:$0xff] }
 0x19f   : > { %v2571_v47 = vadd.f32 %v4772_v4, %v2408_v30  ;;  %4894 = vmatpush3.msra.mxu0 %v7262_v22  ;;  %4957 = vmatprep.subr.mxu1 %v7263_v24  ;;  %v4747_v32 = vpop.f32.mrf.mxu0  ;;  %v2754_v62 = vsub.f32 %v6516_v33, %v2753_v54  ;;  %v6555_v4 = vand.u32 4294901760, %v2607_v26  ;;  %v2764_v40 = vsub.f32 %v6506_v41, %v2763_v8  ;;  %v4778_v29 = vpop.f32.mrf.mxu1  ;;  %v7270_v22 = vld [vmem:[#allocation15_spill] sm:$0xff] }
 0x1a0   : > { %v6551_v56 = vand.u32 4294901760, %v2606_v52  ;;  %v2565_v46 = vadd.f32 %v2564_v48, %v2402_v45  ;;  %4814 = vmatprep.mubr.f32.mxu0 %v2735_v49  ;;  %4876 = vmatprep.mubr.f32.mxu1 %v6524_v34  ;;  %v2420_v0 = vadd.f32 %v4747_v32, %v6465_v11  ;;  %v2773_v48 = vand.u32 4294901760, %v6537_v2  ;;  %v7266_v11 = vld [vmem:[#allocation60_spill] sm:$0xff] }
 0x1a1   : > { %v2609_v63 = vmul.f32 %v2571_v47, %v7264_v61  ;;  %4895 = vmatprep.subr.mxu0 %v7265_v6  ;;  %4958 = vmatpush3.msra.mxu1 %v7263_v24  ;;  %v2413_v7 = vpop.f32.mrf.mxu0  ;;  %v2755_v31 = vand.u32 4294901760, %v2754_v62  ;;  %v2257_v35 = vadd.f32 %v7267_v51, %v2063_v39  ;;  %v7174_v49 = vand.u32 4294901760, %v6544_v43 }
 0x1a2   : > { %v6565_v16 = vsub.f32 %v2606_v52, %v6551_v56  ;;  %v2608_v23 = vmul.f32 %v2565_v46, %v7266_v11  ;;  %v2583_v53 = vadd.f32 %v4775_v60, %v2420_v0  ;;  %4815 = vmatmul.mubr.f32.gmra.mxu0 %v2745_v5  ;;  %4877 = vmatmul.mubr.f32.gmra.mxu1 %v6518_v25  ;;  %v7269_v52 = vld [vmem:[#allocation61_spill] sm:$0xff]  ;;  %v2765_v32 = vand.u32 4294901760, %v2764_v40  ;;  %v2588_v40 = vpop.f32.mrf.mxu1 }
 0x1a3   : > { %4896 = vmatpush3.msra.mxu0 %v7265_v6  ;;  %4959 = vmatprep.subr.mxu1 %v7268_v14  ;;  %v2414_v30 = vadd.f32 %v2413_v7, %v6468_v9  ;;  %v4750_v38 = vpop.f32.mrf.mxu0  ;;  %v2774_v45 = vsub.f32 %v6537_v2, %v2773_v48  ;;  %v7271_v9 = vld [vmem:[#allocation25_spill] sm:$0xff]  ;;  %v6586_v46 = vsub.f32 %v2607_v26, %v6555_v4  ;;  %v6590_v61 = vand.u32 4294901760, %v2609_v63  ;;  %v7272_v6 = vld [vmem:[#allocation62_spill] sm:$0xff]  ;;  %v7273_v7 = vld [vmem:[#allocation19_spill] sm:$0xff] }
 0x1a4   : > { %v6574_v44 = vand.u32 4294901760, %v2608_v23  ;;  %v2611_v60 = vmul.f32 %v2583_v53, %v7269_v52  ;;  %4897 = vmatprep.subr.mxu0 %v7270_v22  ;;  %4960 = vmatpush3.msra.mxu1 %v7268_v14  ;;  %v2432_v39 = vadd.f32 %v4750_v38, %v6503_v50  ;;  %v7170_v50 = vand.u32 4294901760, %v6565_v16  ;;  %v7274_v53 = vld [vmem:[#allocation63_spill] sm:$0xff]  ;;  %v7277_v52 = vld [vmem:[#allocation64_spill] sm:$0xff] }
 0x1a5   : > { %v2577_v47 = vadd.f32 %v2576_v19, %v2414_v30  ;;  %4898 = vmatpush3.msra.mxu0 %v7270_v22  ;;  %4961 = vmatprep.subr.mxu1 %v7271_v9  ;;  %v2425_v62 = vpop.f32.mrf.mxu0  ;;  %v2784_v26 = vsub.f32 %v6544_v43, %v7174_v49  ;;  %v7275_v30 = vld [vmem:[#allocation28_spill] sm:$0xff] }
 0x1a6   : > { %4817 = vmatprep.mubr.f32.mxu0 %v2755_v31  ;;  %4879 = vmatprep.mubr.f32.mxu1 %v6551_v56  ;;  %v2595_v0 = vadd.f32 %v4778_v29, %v2432_v39  ;;  %v2426_v5 = vadd.f32 %v2425_v62, %v2257_v35  ;;  %v6599_v11 = vsub.f32 %v2608_v23, %v6574_v44  ;;  %v2775_v35 = vand.u32 4294901760, %v2774_v45  ;;  %v7276_v29 = vld [vmem:[#allocation20_spill] sm:$0xff]  ;;  %v7278_v45 = vld [vmem:[#allocation31_spill] sm:$0xff] }
 0x1a7   : > { %v2610_v19 = vmul.f32 %v2577_v47, %v7272_v6  ;;  %4899 = vmatprep.subr.mxu0 %v7273_v7  ;;  %4962 = vmatpush3.msra.mxu1 %v7271_v9  ;;  %v2794_v22 = vsub.f32 %v6565_v16, %v7170_v50  ;;  %v7169_v39 = vand.u32 4294901760, %v6586_v46  ;;  %v6617_v47 = vsub.f32 %v2609_v63, %v6590_v61  ;;  %v7287_v50 = vld [vmem:[#allocation35_spill] sm:$0xff] }
 0x1a8   : > { %v2613_v31 = vmul.f32 %v2595_v0, %v7274_v53  ;;  %4818 = vmatmul.mubr.f32.gmra.mxu0 %v2765_v32  ;;  %4880 = vmatmul.mubr.f32.gmra.mxu1 %v6555_v4  ;;  %v2589_v51 = vadd.f32 %v2588_v40, %v2426_v5  ;;  %v2785_v32 = vand.u32 4294901760, %v2784_v26  ;;  %v7167_v62 = vand.u32 4294901760, %v6599_v11  ;;  %v7279_v0 = vld [vmem:[#allocation24_spill] sm:$0xff]  ;;  %v7280_v40 = vld [vmem:[#allocation33_spill] sm:$0xff]  ;;  %v7281_v53 = vld [vmem:[#allocation27_spill] sm:$0xff] }
 0x1a9   : > { %4900 = vmatpush3.msra.mxu0 %v7273_v7  ;;  %4963 = vmatprep.subr.mxu1 %v7275_v30  ;;  %v6605_v38 = vand.u32 4294901760, %v2610_v19  ;;  %v6623_v5 = vand.u32 4294901760, %v2611_v60  ;;  %v2795_v63 = vand.u32 4294901760, %v2794_v22  ;;  %v2804_v7 = vsub.f32 %v6586_v46, %v7169_v39 }
 0x1aa   : > { %4901 = vmatprep.subr.mxu0 %v7276_v29  ;;  %4964 = vmatpush3.msra.mxu1 %v7275_v30  ;;  %v2612_v23 = vmul.f32 %v2589_v51, %v7277_v52  ;;  %v7168_v51 = vand.u32 4294901760, %v6617_v47 }
 0x1ab   : > { %4902 = vmatpush3.msra.mxu0 %v7276_v29  ;;  %4965 = vmatprep.subr.mxu1 %v7278_v45  ;;  %v6626_v6 = vsub.f32 %v2610_v19, %v6605_v38  ;;  %v2814_v19 = vsub.f32 %v6599_v11, %v7167_v62  ;;  %v6645_v29 = vsub.f32 %v2611_v60, %v6623_v5  ;;  %v2805_v52 = vand.u32 4294901760, %v2804_v7  ;;  %v7284_v7 = vld [vmem:[#allocation40_spill] sm:$0xff] }
 0x1ac   : > { %4820 = vmatprep.mubr.f32.mxu0 %v2775_v35  ;;  %4882 = vmatprep.mubr.f32.mxu1 %v6574_v44  ;;  %v6634_v26 = vand.u32 4294901760, %v2612_v23  ;;  %v7282_v35 = vld [vmem:[#allocation36_spill] sm:$0xff] }
 0x1ad   : > { %4903 = vmatprep.subr.mxu0 %v7279_v0  ;;  %4966 = vmatpush3.msra.mxu1 %v7278_v45  ;;  %v7171_v22 = vand.u32 4294901760, %v6626_v6  ;;  %v2815_v60 = vand.u32 4294901760, %v2814_v19  ;;  %v7286_v19 = vld [vmem:[#allocation43_spill] sm:$0xff] }
 0x1ae   : > { %4821 = vmatmul.mubr.f32.gmra.mxu0 %v2785_v32  ;;  %4883 = vmatmul.mubr.f32.gmra.mxu1 %v6590_v61  ;;  %v7283_v32 = vld [vmem:[#allocation30_spill] sm:$0xff]  ;;  %v6654_v62 = vsub.f32 %v2612_v23, %v6634_v26 }
 0x1af   : > { %4904 = vmatpush3.msra.mxu0 %v7279_v0  ;;  %4967 = vmatprep.subr.mxu1 %v7280_v40  ;;  %v6651_v0 = vand.u32 4294901760, %v2613_v31  ;;  %v2834_v23 = vsub.f32 %v6626_v6, %v7171_v22 }
 0x1b0   : > { %4905 = vmatprep.subr.mxu0 %v7281_v53  ;;  %4968 = vmatpush3.msra.mxu1 %v7280_v40  ;;  %v7173_v39 = vand.u32 4294901760, %v6654_v62 }
 0x1b1   : > { %4906 = vmatpush3.msra.mxu0 %v7281_v53  ;;  %4969 = vmatprep.subr.mxu1 %v7282_v35  ;;  %v7285_v53 = vld [vmem:[#allocation34_spill] sm:$0xff]  ;;  %v2835_v22 = vand.u32 4294901760, %v2834_v23  ;;  %v7290_v23 = vld [vmem:[#allocation49_spill] sm:$0xff] }
 0x1b2   : > { %4823 = vmatprep.mubr.f32.mxu0 %v2795_v63  ;;  %4885 = vmatprep.mubr.f32.mxu1 %v6605_v38  ;;  %v2824_v63 = vsub.f32 %v6617_v47, %v7168_v51  ;;  %v6671_v51 = vsub.f32 %v2613_v31, %v6651_v0  ;;  %v7288_v31 = vld [vmem:[#allocation46_spill] sm:$0xff] }
 0x1b3   : > { %4907 = vmatprep.subr.mxu0 %v7283_v32  ;;  %4970 = vmatpush3.msra.mxu1 %v7282_v35 }
 0x1b4   : > { %4824 = vmatmul.mubr.f32.gmra.mxu0 %v2805_v52  ;;  %4886 = vmatmul.mubr.f32.gmra.mxu1 %v6623_v5  ;;  %v7172_v52 = vand.u32 4294901760, %v6645_v29 }
 0x1b5   : > { %4908 = vmatpush3.msra.mxu0 %v7283_v32  ;;  %4971 = vmatprep.subr.mxu1 %v7284_v7  ;;  %v2825_v32 = vand.u32 4294901760, %v2824_v63  ;;  %v2854_v63 = vsub.f32 %v6654_v62, %v7173_v39 }
 0x1b6   : > { %4909 = vmatprep.subr.mxu0 %v7285_v53  ;;  %4972 = vmatpush3.msra.mxu1 %v7284_v7 }
 0x1b7   : > { %4910 = vmatpush3.msra.mxu0 %v7285_v53  ;;  %4973 = vmatprep.subr.mxu1 %v7286_v19  ;;  %v2844_v53 = vsub.f32 %v6645_v29, %v7172_v52  ;;  %v7291_v52 = vld [vmem:[#allocation42_spill] sm:$0xff]  ;;  %v2855_v39 = vand.u32 4294901760, %v2854_v63 }
 0x1b8   : > { %4826 = vmatprep.mubr.f32.mxu0 %v2815_v60  ;;  %4888 = vmatprep.mubr.f32.mxu1 %v6634_v26  ;;  %v7289_v60 = vld [vmem:[#allocation39_spill] sm:$0xff] }
 0x1b9   : > { %4911 = vmatprep.subr.mxu0 %v7287_v50  ;;  %4974 = vmatpush3.msra.mxu1 %v7286_v19 }
 0x1ba   : > { %4827 = vmatmul.mubr.f32.gmra.mxu0 %v2825_v32  ;;  %4889 = vmatmul.mubr.f32.gmra.mxu1 %v6651_v0  ;;  %v2863_v32 = vand.u32 4294901760, %v6671_v51 }
 0x1bb   : > { %4912 = vmatpush3.msra.mxu0 %v7287_v50  ;;  %4975 = vmatprep.subr.mxu1 %v7288_v31  ;;  %v2845_v50 = vand.u32 4294901760, %v2844_v53 }
 0x1bc   : > { %4913 = vmatprep.subr.mxu0 %v7289_v60  ;;  %4976 = vmatpush3.msra.mxu1 %v7288_v31  ;;  %v2864_v49 = vsub.f32 %v6671_v51, %v2863_v32 }
 0x1bd   : > { %4979 = vmatprep.mubr.f32.mxu1 %v2713_v42  ;;  %4914 = vmatpush3.msra.mxu0 %v7289_v60  ;;  %v7292_v42 = vld [vmem:[#allocation45_spill] sm:$0xff] }
 0x1be   : > { %4977 = vmatprep.subr.mxu1 %v7290_v23  ;;  %4829 = vmatprep.mubr.f32.mxu0 %v2835_v22  ;;  %v7293_v22 = vld [vmem:[#allocation48_spill] sm:$0xff] }
 0x1bf   : > { %4915 = vmatprep.subr.mxu0 %v7291_v52  ;;  %4978 = vmatpush3.msra.mxu1 %v7290_v23 }
 0x1c0   : > { %4830 = vmatmul.mubr.f32.gmra.mxu0 %v2845_v50  ;;  %4980 = vmatmul.mubr.f32.vlgmr.msra.gmra.mxu1 %v2723_v20  ;;  %v2865_v20 = vand.u32 4294901760, %v2864_v49  ;;  %v7315_v49 = vld [vmem:[#allocation44_spill] sm:$0xff] }
 0x1c1   : > { %4916 = vmatpush3.msra.mxu0 %v7291_v52  ;;  %5059 = vmatprep.subr.mxu1 %v7247_v18 }
 0x1c2   : > { %4917 = vmatprep.subr.mxu0 %v7292_v42  ;;  %4982 = vmatprep.mubr.f32.mxu1 %v2733_v21  ;;  %v7294_v21 = vld [vmem:[#allocation51_spill] sm:$0xff] }
 0x1c3   : > { %5060 = vmatpush3.msra.mxu1 %v7247_v18  ;;  %4918 = vmatpush3.msra.mxu0 %v7292_v42  ;;  %v7295_v18 = vld [vmem:[#allocation8_spill] sm:$0xff] }
 0x1c4   : > { %5061 = vmatprep.subr.mxu1 %v7249_v36  ;;  %4832 = vmatprep.mubr.f32.mxu0 %v2855_v39 }
 0x1c5   : > { %4919 = vmatprep.subr.mxu0 %v7293_v22  ;;  %5062 = vmatpush3.msra.mxu1 %v7249_v36  ;;  %v7298_v36 = vand.u32 4294901760, %v6544_v43 }
 0x1c6   : > { %4833 = vmatmul.mubr.f32.gmra.mxu0 %v2865_v20  ;;  %4983 = vmatmul.mubr.f32.gmra.mxu1 %v2743_v59  ;;  %v7302_v59 = vand.u32 4294901760, %v6586_v46 }
 0x1c7   : > { %4920 = vmatpush3.msra.mxu0 %v7293_v22  ;;  %5063 = vmatprep.subr.mxu1 %v7251_v1 }
 0x1c8   : > { %4921 = vmatprep.subr.mxu0 %v7294_v21  ;;  %4923 = vmatprep.mubr.f32.mxu0 %v6458_v13  ;;  %v7296_v13 = vld [vmem:[#allocation11_spill] sm:$0xff] }
 0x1c9   : > { %4985 = vmatprep.mubr.f32.mxu1 %v2753_v54  ;;  %5064 = vmatpush3.msra.mxu1 %v7251_v1  ;;  %v7300_v1 = vld [vmem:[#allocation17_spill] sm:$0xff]  ;;  %v7307_v54 = vand.u32 4294901760, %v6626_v6 }
 0x1ca   : > { %4922 = vmatpush3.msra.mxu0 %v7294_v21  ;;  %5065 = vmatprep.subr.mxu1 %v7254_v15 }
 0x1cb   : > { %5003 = vmatprep.subr.mxu0 %v7295_v18  ;;  %5066 = vmatpush3.msra.mxu1 %v7254_v15  ;;  %v7303_v15 = vand.u32 4294901760, %v6599_v11 }
 0x1cc   : > { %4924 = vmatmul.mubr.f32.vlgmr.msra.gmra.mxu0 %v6444_v17  ;;  %4986 = vmatmul.mubr.f32.gmra.mxu1 %v2763_v8  ;;  %v7297_v17 = vld [vmem:[#allocation14_spill] sm:$0xff]  ;;  %v7308_v8 = vld [vmem:[#allocation29_spill] sm:$0xff] }
 0x1cd   : > { %5004 = vmatpush3.msra.mxu0 %v7295_v18  ;;  %5067 = vmatprep.subr.mxu1 %v7260_v58 }
 0x1ce   : > { %4926 = vmatprep.mubr.f32.mxu0 %v6486_v12  ;;  %4988 = vmatprep.mubr.f32.mxu1 %v2773_v48  ;;  %v7299_v12 = vand.u32 4294901760, %v6565_v16  ;;  %v7312_v48 = vld [vmem:[#allocation37_spill] sm:$0xff] }
 0x1cf   : > { %5005 = vmatprep.subr.mxu0 %v7296_v13  ;;  %5068 = vmatpush3.msra.mxu1 %v7260_v58  ;;  %v7306_v58 = vand.u32 4294901760, %v6617_v47 }
 0x1d0   : > { %5006 = vmatpush3.msra.mxu0 %v7296_v13  ;;  %5069 = vmatprep.subr.mxu1 %v7263_v24 }
 0x1d1   : > { %5007 = vmatprep.subr.mxu0 %v7297_v17  ;;  %5070 = vmatpush3.msra.mxu1 %v7263_v24  ;;  %v7311_v24 = vand.u32 4294901760, %v6654_v62 }
 0x1d2   : > { %4927 = vmatmul.mubr.f32.gmra.mxu0 %v6474_v37  ;;  %4989 = vmatmul.mubr.f32.gmra.mxu1 %v7298_v36  ;;  %v7301_v37 = vld [vmem:[#allocation22_spill] sm:$0xff] }
 0x1d3   : > { %5008 = vmatpush3.msra.mxu0 %v7297_v17  ;;  %5071 = vmatprep.subr.mxu1 %v7268_v14 }
 0x1d4   : > { %4929 = vmatprep.mubr.f32.mxu0 %v6516_v33  ;;  %4991 = vmatprep.mubr.f32.mxu1 %v7299_v12  ;;  %v7304_v33 = vld [vmem:[#allocation23_spill] sm:$0xff] }
 0x1d5   : > { %5009 = vmatprep.subr.mxu0 %v7300_v1  ;;  %5072 = vmatpush3.msra.mxu1 %v7268_v14  ;;  %v7314_v14 = vld [vmem:[#allocation41_spill] sm:$0xff] }
 0x1d6   : > { %5010 = vmatpush3.msra.mxu0 %v7300_v1  ;;  %5073 = vmatprep.subr.mxu1 %v7271_v9 }
 0x1d7   : > { %5011 = vmatprep.subr.mxu0 %v7301_v37  ;;  %5074 = vmatpush3.msra.mxu1 %v7271_v9  ;;  %v7316_v9 = vld [vmem:[#allocation47_spill] sm:$0xff] }
 0x1d8   : > { %4930 = vmatmul.mubr.f32.gmra.mxu0 %v6506_v41  ;;  %4992 = vmatmul.mubr.f32.gmra.mxu1 %v7302_v59  ;;  %v7305_v41 = vld [vmem:[#allocation26_spill] sm:$0xff] }
 0x1d9   : > { %5012 = vmatpush3.msra.mxu0 %v7301_v37  ;;  %5075 = vmatprep.subr.mxu1 %v7275_v30 }
 0x1da   : > { %4932 = vmatprep.mubr.f32.mxu0 %v6537_v2  ;;  %4994 = vmatprep.mubr.f32.mxu1 %v7303_v15  ;;  %v7309_v2 = vld [vmem:[#allocation32_spill] sm:$0xff] }
 0x1db   : > { %5013 = vmatprep.subr.mxu0 %v7304_v33  ;;  %5076 = vmatpush3.msra.mxu1 %v7275_v30 }
 0x1dc   : > { %5014 = vmatpush3.msra.mxu0 %v7304_v33  ;;  %5077 = vmatprep.subr.mxu1 %v7278_v45 }
 0x1dd   : > { %5015 = vmatprep.subr.mxu0 %v7305_v41  ;;  %5078 = vmatpush3.msra.mxu1 %v7278_v45 }
 0x1de   : > { %4933 = vmatmul.mubr.f32.gmra.mxu0 %v6544_v43  ;;  %4995 = vmatmul.mubr.f32.gmra.mxu1 %v7306_v58  ;;  %v7310_v43 = vand.u32 4294901760, %v6645_v29 }
 0x1df   : > { %5016 = vmatpush3.msra.mxu0 %v7305_v41  ;;  %5079 = vmatprep.subr.mxu1 %v7280_v40 }
 0x1e0   : > { %4935 = vmatprep.mubr.f32.mxu0 %v6565_v16  ;;  %4997 = vmatprep.mubr.f32.mxu1 %v7307_v54  ;;  %v7313_v16 = vld [vmem:[#allocation38_spill] sm:$0xff] }
 0x1e1   : > { %5017 = vmatprep.subr.mxu0 %v7308_v8  ;;  %5080 = vmatpush3.msra.mxu1 %v7280_v40 }
 0x1e2   : > { %5018 = vmatpush3.msra.mxu0 %v7308_v8  ;;  %5081 = vmatprep.subr.mxu1 %v7282_v35 }
 0x1e3   : > { %5019 = vmatprep.subr.mxu0 %v7309_v2  ;;  %5082 = vmatpush3.msra.mxu1 %v7282_v35 }
 0x1e4   : > { %4936 = vmatmul.mubr.f32.gmra.mxu0 %v6586_v46  ;;  %4998 = vmatmul.mubr.f32.gmra.mxu1 %v7310_v43  ;;  %v7317_v46 = vld [vmem:[#allocation50_spill] sm:$0xff] }
 0x1e5   : > { %5020 = vmatpush3.msra.mxu0 %v7309_v2  ;;  %5083 = vmatprep.subr.mxu1 %v7284_v7 }
 0x1e6   : > { %4938 = vmatprep.mubr.f32.mxu0 %v6599_v11  ;;  %5000 = vmatprep.mubr.f32.mxu1 %v7311_v24  ;;  %v7318_v11 = vld [vmem:[#allocation52_spill] sm:$0xff] }
 0x1e7   : > { %5021 = vmatprep.subr.mxu0 %v7312_v48  ;;  %5084 = vmatpush3.msra.mxu1 %v7284_v7 }
 0x1e8   : > { %5022 = vmatpush3.msra.mxu0 %v7312_v48  ;;  %5085 = vmatprep.subr.mxu1 %v7286_v19 }
 0x1e9   : > { %5023 = vmatprep.subr.mxu0 %v7313_v16  ;;  %5086 = vmatpush3.msra.mxu1 %v7286_v19 }
 0x1ea   : > { %4939 = vmatmul.mubr.f32.gmra.mxu0 %v6617_v47  ;;  %5001 = vmatmul.mubr.f32.gmra.mxu1 %v2863_v32 }
 0x1eb   : > { %5024 = vmatpush3.msra.mxu0 %v7313_v16  ;;  %5087 = vmatprep.subr.mxu1 %v7288_v31 }
 0x1ec   : > { %4941 = vmatprep.mubr.f32.mxu0 %v6626_v6  ;;  %5025 = vmatprep.subr.mxu0 %v7314_v14 }
 0x1ed   : > { %5088 = vmatpush3.msra.mxu1 %v7288_v31  ;;  %5091 = vmatprep.mubr.f32.mxu1 %v6446_v57 }
 0x1ee   : > { %5026 = vmatpush3.msra.mxu0 %v7314_v14  ;;  %5089 = vmatprep.subr.mxu1 %v7290_v23 }
 0x1ef   : > { %5027 = vmatprep.subr.mxu0 %v7315_v49  ;;  %5090 = vmatpush3.msra.mxu1 %v7290_v23 }
 0x1f0   : > { %4942 = vmatmul.mubr.f32.gmra.mxu0 %v6645_v29  ;;  %5092 = vmatmul.mubr.f32.vlgmr.msra.gmra.mxu1 %v6436_v10 }
 0x1f1   : > { %5028 = vmatpush3.msra.mxu0 %v7315_v49  ;;  %4944 = vmatprep.mubr.f32.mxu0 %v6654_v62 }
 0x1f2   : > { %5029 = vmatprep.subr.mxu0 %v7316_v9  ;;  %5094 = vmatprep.mubr.f32.mxu1 %v6476_v27 }
 0x1f3   : > { %5030 = vmatpush3.msra.mxu0 %v7316_v9 }
 0x1f4   : > { %5031 = vmatprep.subr.mxu0 %v7317_v46  ;;  %4945 = vmatmul.mubr.f32.gmra.mxu0 %v6671_v51 }
 0x1f5   : > { %5032 = vmatpush3.msra.mxu0 %v7317_v46  ;;  %5095 = vmatmul.mubr.f32.gmra.mxu1 %v6460_v55 }
 0x1f6   : > { %5033 = vmatprep.subr.mxu0 %v7318_v11  ;;  %5035 = vmatprep.mubr.f32.mxu0 %v6446_v57 }
 0x1f7   : > { %5097 = vmatprep.mubr.f32.mxu1 %v6508_v28  ;;  %5034 = vmatpush3.msra.mxu0 %v7318_v11 }
 0x1f8   : > { %5036 = vmatmul.mubr.f32.vlgmr.msra.gmra.mxu0 %v6436_v10 }
 0x1f9   : > { %5098 = vmatmul.mubr.f32.gmra.mxu1 %v6490_v3  ;;  %5038 = vmatprep.mubr.f32.mxu0 %v6476_v27 }
 0x1fa   : > { %5100 = vmatprep.mubr.f32.mxu1 %v6524_v34 }
 0x1fc   : > { %5039 = vmatmul.mubr.f32.gmra.mxu0 %v6460_v55 }
 0x1fd   : > { %5101 = vmatmul.mubr.f32.gmra.mxu1 %v6518_v25  ;;  %5041 = vmatprep.mubr.f32.mxu0 %v6508_v28 }
 0x1fe   : > { %5103 = vmatprep.mubr.f32.mxu1 %v6551_v56 }
 0x200   : > { %5042 = vmatmul.mubr.f32.gmra.mxu0 %v6490_v3 }
 0x201   : > { %5104 = vmatmul.mubr.f32.gmra.mxu1 %v6555_v4  ;;  %5044 = vmatprep.mubr.f32.mxu0 %v6524_v34 }
 0x202   : > { %5106 = vmatprep.mubr.f32.mxu1 %v6574_v44 }
 0x204   : > { %5045 = vmatmul.mubr.f32.gmra.mxu0 %v6518_v25 }
 0x205   : > { %5107 = vmatmul.mubr.f32.gmra.mxu1 %v6590_v61  ;;  %5047 = vmatprep.mubr.f32.mxu0 %v6551_v56 }
 0x206   : > { %5109 = vmatprep.mubr.f32.mxu1 %v6605_v38 }
 0x208   : > { %5048 = vmatmul.mubr.f32.gmra.mxu0 %v6555_v4 }
 0x209   : > { %5110 = vmatmul.mubr.f32.gmra.mxu1 %v6623_v5  ;;  %5050 = vmatprep.mubr.f32.mxu0 %v6574_v44 }
 0x20a   : > { %5112 = vmatprep.mubr.f32.mxu1 %v6634_v26 }
 0x20c   : > { %5051 = vmatmul.mubr.f32.gmra.mxu0 %v6590_v61 }
 0x20d   : > { %5113 = vmatmul.mubr.f32.gmra.mxu1 %v6651_v0  ;;  %5053 = vmatprep.mubr.f32.mxu0 %v6605_v38 }
 0x210   : > { %5054 = vmatmul.mubr.f32.gmra.mxu0 %v6623_v5 }
 0x211   : > { %5056 = vmatprep.mubr.f32.mxu0 %v6634_v26 }
 0x214   : > { %5057 = vmatmul.mubr.f32.gmra.mxu0 %v6651_v0 }
 0x253   : > { %v4869_v10 = vpop.f32.mrf.mxu1 }
 0x255   : > { %v6847_v57 = vpop.f32.mrf.mxu1 }
 0x257   : > { %v6849_v55 = vpop.f32.mrf.mxu1 }
 0x259   : > { %v6851_v27 = vpop.f32.mrf.mxu1 }
 0x25c   : > { %v4813_v3 = vpop.f32.mrf.mxu0  ;;  %v6853_v28 = vpop.f32.mrf.mxu1 }
 0x25d   : > { %v3025_v46 = vadd.f32 %v4869_v10, %v4813_v3 }
 0x25e   : > { %v2717_v25 = vpop.f32.mrf.mxu0  ;;  %v6855_v34 = vpop.f32.mrf.mxu1 }
 0x262   : > { %v4816_v56 = vpop.f32.mrf.mxu0  ;;  %v6857_v4 = vpop.f32.mrf.mxu1 }
 0x264   : > { %v6859_v44 = vpop.f32.mrf.mxu0  ;;  %v6861_v61 = vpop.f32.mrf.mxu1 }
 0x268   : > { %v6863_v30 = vpop.f32.mrf.mxu0  ;;  %v6865_v38 = vpop.f32.mrf.mxu1 }
 0x26a   : > { %v6867_v39 = vpop.f32.mrf.mxu0  ;;  %v6869_v45 = vpop.f32.mrf.mxu1 }
 0x26e   : > { %v6871_v47 = vpop.f32.mrf.mxu0  ;;  %v6873_v62 = vpop.f32.mrf.mxu1 }
 0x270   : > { %v6875_v5 = vpop.f32.mrf.mxu0  ;;  %v6877_v6 = vpop.f32.mrf.mxu1 }
 0x274   : > { %v6879_v40 = vpop.f32.mrf.mxu0  ;;  %v6881_v26 = vpop.f32.mrf.mxu1 }
 0x276   : > { %v6883_v51 = vpop.f32.mrf.mxu0  ;;  %v6885_v35 = vpop.f32.mrf.mxu1 }
 0x27a   : > { %v6887_v29 = vpop.f32.mrf.mxu0  ;;  %v6889_v0 = vpop.f32.mrf.mxu1 }
 0x27b   : > { %7319 = vst [vmem:[#allocation67_spill] sm:$0xff] %v6889_v0 }
 0x27c   : > { %v6891_v7 = vpop.f32.mrf.mxu0  ;;  %v6893_v52 = vpop.f32.mrf.mxu1 }
 0x27d   : > { %7320 = vst [vmem:[#allocation65_spill] sm:$0xff] %v6893_v52  ;;  %v3019_v52 = vadd.f32 %v6847_v57, %v2717_v25  ;;  %v3049_v57 = vadd.f32 %v6853_v28, %v6863_v30 }
 0x280   : > { %v6895_v19 = vpop.f32.mrf.mxu0  ;;  %v4981_v53 = vpop.f32.mrf.mxu1 }
 0x282   : > { %v6897_v31 = vpop.f32.mrf.mxu0  ;;  %v3406_v60 = vpop.f32.mrf.mxu1 }
 0x286   : > { %v6899_v63 = vpop.f32.mrf.mxu0  ;;  %v4984_v32 = vpop.f32.mrf.mxu1 }
 0x287   : > { %7321 = vst [vmem:[#allocation70_spill] sm:$0xff] %v6899_v63 }
 0x288   : > { %v6901_v23 = vpop.f32.mrf.mxu0  ;;  %v6903_v50 = vpop.f32.mrf.mxu1 }
 0x289   : > { %7322 = vst [vmem:[#allocation5_spill] sm:$0xff] %v6901_v23 }
 0x28c   : > { %v4925_v42 = vpop.f32.mrf.mxu0  ;;  %v6905_v20 = vpop.f32.mrf.mxu1 }
 0x28d   : > { %v3220_v23 = vadd.f32 %v4925_v42, %v3025_v46 }
 0x28e   : > { %v3212_v22 = vpop.f32.mrf.mxu0  ;;  %v6907_v21 = vpop.f32.mrf.mxu1 }
 0x28f   : > { %v3415_v3 = vadd.f32 %v4981_v53, %v3220_v23  ;;  %v3061_v53 = vadd.f32 %v6857_v4, %v6871_v47 }
 0x292   : > { %v4928_v18 = vpop.f32.mrf.mxu0  ;;  %v6909_v13 = vpop.f32.mrf.mxu1 }
 0x294   : > { %v3226_v17 = vpop.f32.mrf.mxu0  ;;  %v6911_v36 = vpop.f32.mrf.mxu1 }
 0x298   : > { %v4931_v12 = vpop.f32.mrf.mxu0  ;;  %v6913_v1 = vpop.f32.mrf.mxu1 }
 0x29a   : > { %v3240_v37 = vpop.f32.mrf.mxu0  ;;  %v6915_v59 = vpop.f32.mrf.mxu1 }
 0x29e   : > { %v4934_v15 = vpop.f32.mrf.mxu0  ;;  %v6917_v33 = vpop.f32.mrf.mxu1 }
 0x29f   : > { %7323 = vst [vmem:[#allocation53_spill] sm:$0xff] %v6917_v33 }
 0x2a0   : > { %v3254_v41 = vpop.f32.mrf.mxu0  ;;  %v6919_v58 = vpop.f32.mrf.mxu1 }
 0x2a1   : > { %7324 = vst [vmem:[#allocation7_spill] sm:$0xff] %v6919_v58  ;;  %v3213_v58 = vadd.f32 %v3212_v22, %v3019_v52  ;;  %v3248_v22 = vadd.f32 %v4931_v12, %v3049_v57 }
 0x2a4   : > { %v6921_v54 = vpop.f32.mrf.mxu0  ;;  %v6923_v8 = vpop.f32.mrf.mxu1 }
 0x2a5   : > { %7325 = vst [vmem:[#allocation54_spill] sm:$0xff] %v6923_v8 }
 0x2a6   : > { %v6925_v2 = vpop.f32.mrf.mxu0  ;;  %v6927_v43 = vpop.f32.mrf.mxu1 }
 0x2a7   : > { %7326 = vst [vmem:[#allocation10_spill] sm:$0xff] %v6927_v43 }
 0x2aa   : > { %v6929_v24 = vpop.f32.mrf.mxu0  ;;  %v6931_v48 = vpop.f32.mrf.mxu1 }
 0x2ab   : > { %7327 = vst [vmem:[#allocation55_spill] sm:$0xff] %v6931_v48  ;;  %v3037_v48 = vadd.f32 %v6849_v55, %v4816_v56  ;;  %v3407_v55 = vadd.f32 %v3406_v60, %v3213_v58  ;;  %v3043_v56 = vadd.f32 %v6855_v34, %v6867_v39  ;;  %v3055_v60 = vadd.f32 %v6861_v61, %v6875_v5 }
 0x2ac   : > { %v6933_v16 = vpop.f32.mrf.mxu0  ;;  %v6935_v14 = vpop.f32.mrf.mxu1  ;;  %v3067_v5 = vadd.f32 %v6869_v45, %v6883_v51 }
 0x2ad   : > { %7328 = vst [vmem:[#allocation68_spill] sm:$0xff] %v6935_v14  ;;  %v3031_v14 = vadd.f32 %v6851_v27, %v6859_v44  ;;  %v3234_v33 = vadd.f32 %v4928_v18, %v3037_v48  ;;  %v3241_v48 = vadd.f32 %v3240_v37, %v3043_v56  ;;  %v3447_v37 = vadd.f32 %v6905_v20, %v3248_v22 }
 0x2ae   : > { %v3255_v58 = vadd.f32 %v3254_v41, %v3055_v60  ;;  %v3085_v41 = vadd.f32 %v6873_v62, %v6887_v29 }
 0x2af   : > { %v3227_v25 = vadd.f32 %v3226_v17, %v3031_v14  ;;  %v3431_v18 = vadd.f32 %v4984_v32, %v3234_v33  ;;  %v3262_v17 = vadd.f32 %v4934_v15, %v3061_v53  ;;  %v3439_v61 = vadd.f32 %v6907_v21, %v3241_v48 }
 0x2b0   : > { %v6937_v49 = vpop.f32.mrf.mxu0  ;;  %v5093_v9 = vpop.f32.mrf.mxu1 }
 0x2b1   : > { %v3423_v39 = vadd.f32 %v6903_v50, %v3227_v25  ;;  %v3290_v25 = vadd.f32 %v6929_v24, %v3085_v41  ;;  %v3091_v24 = vadd.f32 %v6885_v35, %v6897_v31  ;;  %v7335_v31 = vld [vmem:[#allocation7_spill] sm:$0xff] }
 0x2b2   : > { %v6939_v11 = vpop.f32.mrf.mxu0  ;;  %v3822_v8 = vpop.f32.mrf.mxu1 }
 0x2b3   : > { %7329 = vst [vmem:[#allocation13_spill] sm:$0xff] %v6939_v11 }
 0x2b4   : > { %v6942_v43 = vpop.f32.mrf.mxu0  ;;  %v7342_v41 = vld [vmem:[#allocation68_spill] sm:$0xff] }
 0x2b5   : > { %v5096_v0 = vpop.f32.mrf.mxu1 }
 0x2b6   : > { %v6946_v63 = vpop.f32.mrf.mxu0 }
 0x2b7   : > { %7330 = vst [vmem:[#allocation56_spill] sm:$0xff] %v6946_v63  ;;  %v3834_v10 = vpop.f32.mrf.mxu1 }
 0x2b8   : > { %v5037_v11 = vpop.f32.mrf.mxu0 }
 0x2b9   : > { %v3652_v42 = vadd.f32 %v5037_v11, %v3415_v3  ;;  %v5099_v46 = vpop.f32.mrf.mxu1  ;;  %v3079_v3 = vadd.f32 %v6877_v6, %v6891_v7 }
 0x2ba   : > { %v3645_v52 = vpop.f32.mrf.mxu0 }
 0x2bb   : > { %v3829_v63 = vadd.f32 %v5093_v9, %v3652_v42  ;;  %v3646_v27 = vadd.f32 %v3645_v52, %v3407_v55  ;;  %v3846_v44 = vpop.f32.mrf.mxu1  ;;  %v3283_v55 = vadd.f32 %v6933_v16, %v3079_v3  ;;  %v7333_v16 = vld [vmem:[#allocation67_spill] sm:$0xff] }
 0x2bc   : > { %v5040_v23 = vpop.f32.mrf.mxu0 }
 0x2bd   : > { %3917 = vst [vmem:[%s6958_s7 + $0x8] sm:$0xff] %v3829_v63  ;;  %v3823_v28 = vadd.f32 %v3822_v8, %v3646_v27  ;;  %v3664_v30 = vadd.f32 %v5040_v23, %v3431_v18  ;;  %v5102_v34 = vpop.f32.mrf.mxu1  ;;  %v3073_v63 = vadd.f32 %v6865_v38, %v6879_v40  ;;  %v3463_v40 = vadd.f32 %v6909_v13, %v3262_v17  ;;  %v7332_v27 = vld [vmem:[#allocation70_spill] sm:$0xff]  ;;  %v7334_v23 = vld [vmem:[#allocation13_spill] sm:$0xff] }
 0x2be   : > { %v3657_v32 = vpop.f32.mrf.mxu0 }
 0x2bf   : > { %3916 = vst [vmem:[%s6958_s7] sm:$0xff] %v3823_v28  ;;  %v3841_v4 = vadd.f32 %v5096_v0, %v3664_v30  ;;  %v3658_v47 = vadd.f32 %v3657_v32, %v3423_v39  ;;  %v3858_v12 = vpop.f32.mrf.mxu1  ;;  %v3276_v15 = vadd.f32 %v6921_v54, %v3073_v63  ;;  %v3455_v54 = vadd.f32 %v6911_v36, %v3255_v58  ;;  %v7337_v30 = vld [vmem:[#allocation65_spill] sm:$0xff]  ;;  %v7339_v63 = vld [vmem:[#allocation56_spill] sm:$0xff] }
 0x2c0   : > { %v5043_v33 = vpop.f32.mrf.mxu0  ;;  %v3487_v28 = vadd.f32 %v7335_v31, %v3283_v55 }
 0x2c1   : > { %3919 = vst [vmem:[%s6958_s7 + $0x18] sm:$0xff] %v3841_v4  ;;  %v3835_v50 = vadd.f32 %v3834_v10, %v3658_v47  ;;  %v3676_v8 = vadd.f32 %v5043_v33, %v3447_v37  ;;  %v5105_v14 = vpop.f32.mrf.mxu1  ;;  %v3269_v10 = vadd.f32 %v6925_v2, %v3067_v5  ;;  %v3479_v29 = vadd.f32 %v6913_v1, %v3276_v15  ;;  %v7338_v4 = vld [vmem:[#allocation54_spill] sm:$0xff] }
 0x2c2   : > { %v3669_v0 = vpop.f32.mrf.mxu0  ;;  %v3097_v2 = vadd.f32 %v6881_v26, %v6895_v19  ;;  %v7331_v19 = vld [vmem:[#allocation53_spill] sm:$0xff] }
 0x2c3   : > { %3918 = vst [vmem:[%s6958_s7 + $0x10] sm:$0xff] %v3835_v50  ;;  %v3853_v20 = vadd.f32 %v5099_v46, %v3676_v8  ;;  %v3670_v9 = vadd.f32 %v3669_v0, %v3439_v61  ;;  %v3870_v38 = vpop.f32.mrf.mxu1  ;;  %v3471_v7 = vadd.f32 %v6915_v59, %v3269_v10  ;;  %v3495_v22 = vadd.f32 %v7331_v19, %v3290_v25  ;;  %v7340_v8 = vld [vmem:[#allocation10_spill] sm:$0xff]  ;;  %v7341_v0 = vld [vmem:[#allocation55_spill] sm:$0xff] }
 0x2c4   : > { %v5046_v11 = vpop.f32.mrf.mxu0  ;;  %v3304_v52 = vadd.f32 %v6937_v49, %v3097_v2  ;;  %v3297_v59 = vadd.f32 %v7334_v23, %v3091_v24  ;;  %v7336_v49 = vld [vmem:[#allocation5_spill] sm:$0xff] }
 0x2c5   : > { %3921 = vst [vmem:[%s6958_s7 + $0x28] sm:$0xff] %v3853_v20  ;;  %v3847_v21 = vadd.f32 %v3846_v44, %v3670_v9  ;;  %v3688_v45 = vadd.f32 %v5046_v11, %v3463_v40  ;;  %v5108_v51 = vpop.f32.mrf.mxu1  ;;  %v3109_v44 = vadd.f32 %v7333_v16, %v7332_v27 }
 0x2c6   : > { %v3681_v57 = vpop.f32.mrf.mxu0  ;;  %v3511_v47 = vadd.f32 %v7338_v4, %v3304_v52 }
 0x2c7   : > { %3920 = vst [vmem:[%s6958_s7 + $0x20] sm:$0xff] %v3847_v21  ;;  %v3865_v13 = vadd.f32 %v5102_v34, %v3688_v45  ;;  %v3682_v62 = vadd.f32 %v3681_v57, %v3455_v54  ;;  %v3882_v42 = vpop.f32.mrf.mxu1  ;;  %v3103_v34 = vadd.f32 %v7337_v30, %v7336_v49  ;;  %v3318_v60 = vadd.f32 %v6942_v43, %v3109_v44 }
 0x2c8   : > { %v5049_v46 = vpop.f32.mrf.mxu0 }
 0x2c9   : > { %3923 = vst [vmem:[%s6958_s7 + $0x38] sm:$0xff] %v3865_v13  ;;  %v3859_v36 = vadd.f32 %v3858_v12, %v3682_v62  ;;  %v3700_v6 = vadd.f32 %v5049_v46, %v3479_v29  ;;  %v5111_v18 = vpop.f32.mrf.mxu1  ;;  %v3311_v33 = vadd.f32 %v7339_v63, %v3103_v34  ;;  %v3527_v15 = vadd.f32 %v7341_v0, %v3318_v60 }
 0x2ca   : > { %v3693_v56 = vpop.f32.mrf.mxu0 }
 0x2cb   : > { %3922 = vst [vmem:[%s6958_s7 + $0x30] sm:$0xff] %v3859_v36  ;;  %v3877_v1 = vadd.f32 %v5105_v14, %v3700_v6  ;;  %v3694_v26 = vadd.f32 %v3693_v56, %v3471_v7  ;;  %v3894_v12 = vpop.f32.mrf.mxu1  ;;  %v3503_v14 = vadd.f32 %v7340_v8, %v3297_v59  ;;  %v3519_v11 = vadd.f32 %v7342_v41, %v3311_v33 }
 0x2cc   : > { %v5052_v53 = vpop.f32.mrf.mxu0 }
 0x2cd   : > { %3925 = vst [vmem:[%s6958_s7 + $0x48] sm:$0xff] %v3877_v1  ;;  %v3871_v48 = vadd.f32 %v3870_v38, %v3694_v26  ;;  %v3712_v35 = vadd.f32 %v5052_v53, %v3495_v22  ;;  %v5114_v20 = vpop.f32.mrf.mxu1 }
 0x2ce   : > { %v3705_v39 = vpop.f32.mrf.mxu0 }
 0x2cf   : > { %3924 = vst [vmem:[%s6958_s7 + $0x40] sm:$0xff] %v3871_v48  ;;  %v3889_v32 = vadd.f32 %v5108_v51, %v3712_v35  ;;  %v3706_v17 = vadd.f32 %v3705_v39, %v3487_v28  ;;  %v3906_v51 = vpop.f32.mrf.mxu1 }
 0x2d0   : > { %v5055_v37 = vpop.f32.mrf.mxu0 }
 0x2d1   : > { %3927 = vst [vmem:[%s6958_s7 + $0x58] sm:$0xff] %v3889_v32  ;;  %v3883_v58 = vadd.f32 %v3882_v42, %v3706_v17  ;;  %v3724_v50 = vadd.f32 %v5055_v37, %v3511_v47 }
 0x2d2   : > { %v3717_v61 = vpop.f32.mrf.mxu0 }
 0x2d3   : > { %3926 = vst [vmem:[%s6958_s7 + $0x50] sm:$0xff] %v3883_v58  ;;  %v3901_v43 = vadd.f32 %v5111_v18, %v3724_v50  ;;  %v3718_v5 = vadd.f32 %v3717_v61, %v3503_v14 }
 0x2d4   : > { %v5058_v9 = vpop.f32.mrf.mxu0 }
 0x2d5   : > { %3929 = vst [vmem:[%s6958_s7 + $0x68] sm:$0xff] %v3901_v43  ;;  %v3895_v38 = vadd.f32 %v3894_v12, %v3718_v5  ;;  %v3736_v40 = vadd.f32 %v5058_v9, %v3527_v15 }
 0x2d6   : > { %v3729_v10 = vpop.f32.mrf.mxu0 }
 0x2d7   : > { %3928 = vst [vmem:[%s6958_s7 + $0x60] sm:$0xff] %v3895_v38  ;;  %v3913_v21 = vadd.f32 %v5114_v20, %v3736_v40  ;;  %v3730_v45 = vadd.f32 %v3729_v10, %v3519_v11 }
 0x2d9   : > { %3931 = vst [vmem:[%s6958_s7 + $0x78] sm:$0xff] %v3913_v21  ;;  %v3907_v54 = vadd.f32 %v3906_v51, %v3730_v45 }
 0x2db   : > { %3930 = vst [vmem:[%s6958_s7 + $0x70] sm:$0xff] %v3907_v54 }
 0x2dc   : > { %5169 = shalt.err (!%p5166_p3)
}
 0x2dd   : > { %s5170_s17 = scalar_lea.hbm %s7018_s12, 2048  ;;  %s5174_s26 = scalar_lea.hbm %s7071_s5, 4096 }
 0x2de   : > { %p5171_p4 = scmp.ne.s32.totalorder %s7018_s12, %s5170_s17  ;;  %p5175_p9 = scmp.lt.s32.totalorder %s7018_s12, %s7071_s5 }
 0x2df   : > { %p5176_p10 = scmp.lt.s32.totalorder %s5174_s26, %s5170_s17 }
 0x2e0   : > { %p5172_p7 = pnand %p5171_p4, %p5289_p5 }
 0x2e1   : > { %p5177_p11 = por %p5176_p10, %p5175_p9 }
 0x2e2   : > { %p5173_p8 = pneg %p5172_p7 }
 0x2e4   : > { %p5178_p12 = pnand %p5177_p11, %p5173_p8 }
 0x2e6   : > { %5181 = shalt.err (!%p5178_p12)
}
 0x2e7   : > { %s5219_s7 = smov 128   ;;  %s5220_s8 = smov 8  }
 0x2e8   : > { %5115 = dma.vmem_to_hbm [thread:$0]  (%p5289_p5), %s7020_s9, 2048, %s7018_s12, %s7026_s22, %s5219_s7, %s5219_s7, %s5220_s8  }
 0x2e9 PF: > { %p5121_p13 = scmp.ge.s32.totalorder %s5216_s21, 2  ;;  %s3961_s10 = sand.u32 1, %s5204_s18  }
 0x2ea   : > { %s3962_s11 = scalar_lea.sflag [#allocation3], %s3961_s10 }
 0x2eb   : > { %p5118_p0 = pnand %p5121_p13, %p5293_p6 }
 0x2ed   : > { %p5119_p1 = pneg %p5118_p0 }
 0x2ef   : > { %5199 = dma.done.wait (%p5119_p1), %s3962_s11, 2048  }
 0x2f0   : > { %5201 = vsyncadd (%p5119_p1), %s3962_s11, 4294965248  ;;  %p15_p2 = scmp.ge.s32.totalorder %s5276_s24, 4   ;;  %s7343_s18 = smov %s5208_s19 }
 0x2f1   : > { %s7344_s19 = smov %s5212_s20  ;;  %s7345_s20 = smov %s5287_s27 }
 0x2f2   : > { %s7346_s21 = smov %s5276_s24  ;;  %17 = sbr.rel (!%p15_p2) target bundleno = 3 (0x3), region = 78 }
 0x2f7   :  { %3967 = vsyncpa [#allocation3], 1 }
 0x2f8   :  { %3969 = vsyncpa [#allocation3 + $0x1], 1 }

</bundles_post_ra>
